<compile_context>
chip_gen: v5e
topology: v5e:2x2
jax: 0.10.0
libtpu: 0.0.40
codegen_flags: <defaults>
</compile_context>

<pallas_src>
import functools

import jax
import jax.numpy as jnp
from jax.experimental import pallas as pl
from jax.experimental.pallas import tpu as pltpu

TM = 256          # row tile (multiple of 256 -> fills the 256-wide MXU on v6e/v7x)
TK = 512          # A column (reduction) tile for the large-N fallback path
LANE = 128


# ------------------------------- helpers --------------------------------------
def _round_up(x, m):
    return ((x + m - 1) // m) * m


def _pad2(a, rows, cols):
    return jnp.pad(a, ((0, rows - a.shape[0]), (0, cols - a.shape[1])))


def _vmem_budget_bytes():
    """Generation-aware VMEM budget (~75% of per-TC VMEM; 48 MiB on v7x, 96 MiB v5e/v6e)."""
    cap = 64 * 1024 * 1024  # conservative default = v7x per-TC VMEM
    try:
        cap = int(getattr(pltpu.get_tpu_info(), "vmem_capacity_bytes", cap)) or cap
    except Exception:
        pass
    cap = max(32 * 1024 * 1024, min(cap, 128 * 1024 * 1024))
    return (cap * 3) // 4


def _fused_vmem_bytes(n_pad, f_pad, h_pad, c_pad):
    a = n_pad * n_pad * 2
    x = n_pad * f_pad * 2
    w = (f_pad * h_pad + h_pad * h_pad + h_pad * c_pad) * 2
    inter = 4 * n_pad * h_pad * 4           # xw1 / h1 / hw2 / h2 live f32 temporaries
    out = n_pad * c_pad * 4
    return a + x + w + inter + out


def _resident_vmem_bytes(tm, n_pad, h_pad, c_pad):
    a_band = 2 * tm * n_pad * 2             # double-buffered A row band
    rhs = 2 * n_pad * h_pad * 2             # resident RHS (counted double, conservative)
    w = 2 * h_pad * c_pad * 2
    out = 2 * tm * c_pad * 4
    temps = 2 * tm * max(h_pad, c_pad) * 4
    return a_band + rhs + w + out + temps


# ------------------------------- kernels ---------------------------------------
def _fused_forward_kernel(a_ref, x_ref, w1_ref, b1_ref, w2_ref, b2_ref,
                          wc_ref, bc_ref, o_ref):
    """Whole forward in one kernel (small-N fast path, everything VMEM-resident)."""
    a = a_ref[...]
    xw1 = jnp.dot(x_ref[...], w1_ref[...], preferred_element_type=jnp.float32)
    h1 = jnp.maximum(
        jnp.dot(a, xw1.astype(a.dtype), preferred_element_type=jnp.float32)
        + b1_ref[...], 0.0)
    hw2 = jnp.dot(h1.astype(w2_ref.dtype), w2_ref[...],
                  preferred_element_type=jnp.float32)
    h2 = jnp.maximum(
        jnp.dot(a, hw2.astype(a.dtype), preferred_element_type=jnp.float32)
        + b2_ref[...], 0.0)
    o_ref[...] = (jnp.dot(h2.astype(wc_ref.dtype), wc_ref[...],
                          preferred_element_type=jnp.float32)
                  + bc_ref[...]).astype(o_ref.dtype)


def _rowblock_matmul_kernel(x_ref, w_ref, o_ref):
    """One row tile of X @ W (full K and N in the block)."""
    o_ref[...] = jnp.dot(x_ref[...], w_ref[...],
                         preferred_element_type=jnp.float32).astype(o_ref.dtype)


def _gcn_layer_resident_kernel(a_ref, r_ref, b_ref, wn_ref, bn_ref, o_ref):
    """out_tile = relu(A[row_tile, :] @ R + b) @ Wn + bn  with R fully VMEM-resident."""
    agg = jnp.dot(a_ref[...], r_ref[...], preferred_element_type=jnp.float32)
    h = jnp.maximum(agg + b_ref[...], 0.0)
    o_ref[...] = (jnp.dot(h.astype(wn_ref.dtype), wn_ref[...],
                          preferred_element_type=jnp.float32)
                  + bn_ref[...]).astype(o_ref.dtype)


def _gcn_layer_reduce_kernel(a_ref, r_ref, b_ref, wn_ref, bn_ref, o_ref, acc_ref):
    """Same layer, tiled over the A column (reduction) axis with an f32 accumulator."""
    k = pl.program_id(1)

    @pl.when(k == 0)
    def _init():
        acc_ref[...] = jnp.zeros_like(acc_ref)

    acc_ref[...] += jnp.dot(a_ref[...], r_ref[...],
                            preferred_element_type=jnp.float32)

    @pl.when(k == pl.num_programs(1) - 1)
    def _finalize():
        h = jnp.maximum(acc_ref[...] + b_ref[...], 0.0)
        o_ref[...] = (jnp.dot(h.astype(wn_ref.dtype), wn_ref[...],
                              preferred_element_type=jnp.float32)
                      + bn_ref[...]).astype(o_ref.dtype)


# --------------------------- pallas_call wrappers -------------------------------
def _fused_forward(a, x, w1, b1, w2, b2, wc, bc, out_dtype, vmem_limit):
    n_pad, f_pad = x.shape
    h_pad = w1.shape[1]
    c_pad = wc.shape[1]
    flops = int(2 * n_pad * (f_pad * h_pad + 2 * n_pad * h_pad
                             + h_pad * h_pad + h_pad * c_pad))
    bytes_acc = int(a.size * 2 + x.size * 2
                    + (w1.size + w2.size + wc.size) * 2
                    + n_pad * c_pad * jnp.dtype(out_dtype).itemsize)
    return pl.pallas_call(
        _fused_forward_kernel,
        out_shape=jax.ShapeDtypeStruct((n_pad, c_pad), out_dtype),
        compiler_params=pltpu.CompilerParams(vmem_limit_bytes=int(vmem_limit)),
        cost_estimate=pl.CostEstimate(flops=flops, transcendentals=0,
                                      bytes_accessed=bytes_acc),
    )(a, x, w1, b1, w2, b2, wc, bc)


def _dense_rowblock_matmul(x, w, out_dtype, vmem_limit, tm=TM):
    m, kdim = x.shape
    _, n = w.shape
    flops = int(2 * m * kdim * n)
    bytes_acc = int(x.size * x.dtype.itemsize + w.size * w.dtype.itemsize
                    + m * n * jnp.dtype(out_dtype).itemsize)
    return pl.pallas_call(
        _rowblock_matmul_kernel,
        out_shape=jax.ShapeDtypeStruct((m, n), out_dtype),
        grid_spec=pltpu.PrefetchScalarGridSpec(
            num_scalar_prefetch=0,
            grid=(m // tm,),
            in_specs=[pl.BlockSpec((tm, kdim), lambda i: (i, 0)),
                      pl.BlockSpec((kdim, n), lambda i: (0, 0))],
            out_specs=pl.BlockSpec((tm, n), lambda i: (i, 0))),
        compiler_params=pltpu.CompilerParams(
            dimension_semantics=("parallel",),
            vmem_limit_bytes=int(vmem_limit)),
        cost_estimate=pl.CostEstimate(flops=flops, transcendentals=0,
                                      bytes_accessed=bytes_acc),
    )(x, w)


def _gcn_layer_resident(a, rhs, bias, w_next, b_next, out_dtype, vmem_limit, tm=TM):
    """Row-tiled GCN layer with the RHS fully VMEM resident (no reduction axis)."""
    n_pad = a.shape[0]
    h = rhs.shape[1]
    c = w_next.shape[1]
    flops = int(2 * n_pad * n_pad * h + 2 * n_pad * h * c)
    bytes_acc = int(a.size * 2 + rhs.size * 2 + w_next.size * 2
                    + n_pad * c * jnp.dtype(out_dtype).itemsize)
    return pl.pallas_call(
        _gcn_layer_resident_kernel,
        out_shape=jax.ShapeDtypeStruct((n_pad, c), out_dtype),
        grid_spec=pltpu.PrefetchScalarGridSpec(
            num_scalar_prefetch=0,
            grid=(n_pad // tm,),
            in_specs=[pl.BlockSpec((tm, n_pad), lambda i: (i, 0)),   # contiguous A row band
                      pl.BlockSpec((n_pad, h), lambda i: (0, 0)),    # RHS resident
                      pl.BlockSpec((1, h), lambda i: (0, 0)),        # bias
                      pl.BlockSpec((h, c), lambda i: (0, 0)),        # next-layer W
                      pl.BlockSpec((1, c), lambda i: (0, 0))],       # next-layer bias
            out_specs=pl.BlockSpec((tm, c), lambda i: (i, 0))),
        compiler_params=pltpu.CompilerParams(
            dimension_semantics=("parallel",),
            vmem_limit_bytes=int(vmem_limit)),
        cost_estimate=pl.CostEstimate(flops=flops, transcendentals=0,
                                      bytes_accessed=bytes_acc),
    )(a, rhs, bias, w_next, b_next)


def _gcn_layer_reduce(a, rhs, bias, w_next, b_next, out_dtype, vmem_limit,
                      tm=TM, tk=TK):
    """Fallback for very large N: big (TM, TK) A tiles + f32 accumulator reduction."""
    n_pad = a.shape[0]
    h = rhs.shape[1]
    c = w_next.shape[1]
    n_row_tiles = n_pad // tm
    flops = int(2 * n_pad * n_pad * h + 2 * n_pad * h * c)
    bytes_acc = int(a.size * 2 + rhs.size * 2 * n_row_tiles + w_next.size * 2
                    + n_pad * c * jnp.dtype(out_dtype).itemsize)
    return pl.pallas_call(
        _gcn_layer_reduce_kernel,
        out_shape=jax.ShapeDtypeStruct((n_pad, c), out_dtype),
        grid_spec=pltpu.PrefetchScalarGridSpec(
            num_scalar_prefetch=0,
            grid=(n_row_tiles, n_pad // tk),
            in_specs=[pl.BlockSpec((tm, tk), lambda i, k: (i, k)),   # A tile
                      pl.BlockSpec((tk, h), lambda i, k: (k, 0)),    # hoisted RHS tile
                      pl.BlockSpec((1, h), lambda i, k: (0, 0)),
                      pl.BlockSpec((h, c), lambda i, k: (0, 0)),
                      pl.BlockSpec((1, c), lambda i, k: (0, 0))],
            out_specs=pl.BlockSpec((tm, c), lambda i, k: (i, 0)),
            scratch_shapes=[pltpu.VMEM((tm, h), jnp.float32)]),
        compiler_params=pltpu.CompilerParams(
            dimension_semantics=("parallel", "arbitrary"),
            vmem_limit_bytes=int(vmem_limit)),
        cost_estimate=pl.CostEstimate(flops=flops, transcendentals=0,
                                      bytes_accessed=bytes_acc),
    )(a, rhs, bias, w_next, b_next)


# ------------------------------ glue (plain JAX) --------------------------------
def gcn_normalized_adjacency(edge_index, num_nodes):
    """Dense D^-1/2 (A + I) D^-1/2 matching PyG gcn_norm (add_self_loops=True).

    GCNConv aggregates at the target node: A[dst, src] = 1, degree is the in-degree
    at dst including the self loop.  D^-1/2 is folded directly into the scattered
    values (single value-scatter, no dense 0/1 A + rescale).
    """
    src = edge_index[0]
    dst = edge_index[1]
    deg = jnp.zeros((num_nodes,), jnp.float32).at[dst].add(1.0) + 1.0   # + self loop
    d_inv_sqrt = jnp.where(deg > 0.0, jax.lax.rsqrt(deg), 0.0)
    vals = d_inv_sqrt[dst] * d_inv_sqrt[src]
    a = jnp.zeros((num_nodes, num_nodes), jnp.float32).at[dst, src].add(vals)
    a = a + jnp.diag(d_inv_sqrt * d_inv_sqrt)
    # TODO(synk): emit a banded/block-sparse form directly for very large N (the
    # sentence graph is a near-chain) instead of materializing the dense N^2 array.
    return a


def sentence_gnn_forward(x, edge_index, params, *, force_path=None):
    n, f = x.shape
    hidden = params["w1"].shape[1]
    num_classes = params["wc"].shape[1]
    budget = _vmem_budget_bytes()

    a_norm = gcn_normalized_adjacency(edge_index, n)

    f_pad = _round_up(f, LANE)
    h_pad = _round_up(hidden, LANE)
    c_pad = _round_up(num_classes, LANE)

    n_pad_small = _round_up(n, LANE)
    use_fused = (force_path == "fused"
                 or (force_path is None
                     and _fused_vmem_bytes(n_pad_small, f_pad, h_pad, c_pad) <= budget))
    n_pad = n_pad_small if use_fused else _round_up(n, max(TM, TK))

    # Pad node axis to the tile size and feature-ish axes to lane width (128).
    # Padding is inert: padded A rows/cols are exactly zero, sliced off at the end.
    a_p = _pad2(a_norm, n_pad, n_pad).astype(jnp.bfloat16)
    x_p = _pad2(x.astype(jnp.float32), n_pad, f_pad).astype(jnp.bfloat16)
    w1_p = _pad2(params["w1"], f_pad, h_pad).astype(jnp.bfloat16)
    w2_p = _pad2(params["w2"], h_pad, h_pad).astype(jnp.bfloat16)
    wc_p = _pad2(params["wc"], h_pad, c_pad).astype(jnp.bfloat16)
    b1_p = _pad2(params["b1"].reshape(1, -1), 1, h_pad).astype(jnp.float32)
    b2_p = _pad2(params["b2"].reshape(1, -1), 1, h_pad).astype(jnp.float32)
    bc_p = _pad2(params["bc"].reshape(1, -1), 1, c_pad).astype(jnp.float32)
    zero_h = jnp.zeros((1, h_pad), jnp.float32)

    if use_fused:
        logits_p = _fused_forward(a_p, x_p, w1_p, b1_p, w2_p, b2_p, wc_p, bc_p,
                                  jnp.float32, budget)
        return logits_p[:n, :num_classes]

    use_resident = (force_path == "resident"
                    or (force_path is None
                        and _resident_vmem_bytes(TM, n_pad, h_pad,
                                                 max(h_pad, c_pad)) <= budget))
    layer = _gcn_layer_resident if use_resident else _gcn_layer_reduce

    # Pass 1: hoisted layer-1 feature transform  XW1 = X @ W1   [N_pad, H_pad]
    xw1 = _dense_rowblock_matmul(x_p, w1_p, jnp.bfloat16, budget)
    # Pass 2: relu(A @ XW1 + b1) @ W2                            [N_pad, H_pad]
    hw2 = layer(a_p, xw1, b1_p, w2_p, zero_h, jnp.bfloat16, budget)
    # Pass 3: relu(A @ HW2 + b2) @ Wc + bc                       [N_pad, C_pad]
    logits_p = layer(a_p, hw2, b2_p, wc_p, bc_p, jnp.float32, budget)
    return logits_p[:n, :num_classes]


def init_params(key, input_dim, hidden_dim, num_classes):
    k1, k2, k3, k4 = jax.random.split(key, 4)
    scale1 = 1.0 / jnp.sqrt(input_dim)
    scale2 = 1.0 / jnp.sqrt(hidden_dim)
    # GCNConv weights stored [in, out]; nn.Linear weight stored transposed to [in, out].
    return {
        "w1": jax.random.normal(k1, (input_dim, hidden_dim), jnp.float32) * scale1,
        "b1": jnp.zeros((hidden_dim,), jnp.float32),
        "w2": jax.random.normal(k2, (hidden_dim, hidden_dim), jnp.float32) * scale2,
        "b2": jnp.zeros((hidden_dim,), jnp.float32),
        "wc": jax.random.normal(k3, (hidden_dim, num_classes), jnp.float32) * scale2,
        "bc": jax.random.normal(k4, (num_classes,), jnp.float32) * scale2,
    }


if __name__ == "__main__":
    # 200 sentence nodes, 96-d features (stand-in for the 768-d InLegalBERT embeddings),
    # hidden=128 (as in the spec), 7 rhetorical-role classes.
    num_nodes, input_dim, hidden_dim, num_classes = 200, 96, 128, 7

    key = jax.random.PRNGKey(0)
    kx, kp = jax.random.split(key)
    x = jax.random.normal(kx, (num_nodes, input_dim), jnp.float32)

    # Deterministic edge_index: a chain graph (both directions) + a few skip edges.
    src = (list(range(num_nodes - 1)) + list(range(1, num_nodes)) + [0, 50, 100])
    dst = (list(range(1, num_nodes)) + list(range(num_nodes - 1)) + [100, 150, 199])
    edge_index = jnp.array([src, dst], dtype=jnp.int32)

    params = init_params(kp, input_dim, hidden_dim, num_classes)

    # Default dispatch (fused small-N fast path at this scale).
    logits = jax.jit(sentence_gnn_forward)(x, edge_index, params)
    jax.block_until_ready(logits)
    assert logits.shape == (num_nodes, num_classes)
    assert bool(jnp.all(jnp.isfinite(logits)))

    # Also exercise the large-N code paths (RHS-resident and tiled-reduction) and
    # cross-check against the fused result (bf16 MXU feeds -> loose tolerance).
    logits_res = jax.jit(
        functools.partial(sentence_gnn_forward, force_path="resident"))(x, edge_index, params)
    logits_red = jax.jit(
        functools.partial(sentence_gnn_forward, force_path="reduce"))(x, edge_index, params)
    jax.block_until_ready((logits_res, logits_red))
    assert logits_res.shape == (num_nodes, num_classes)
    assert logits_red.shape == (num_nodes, num_classes)
    assert float(jnp.max(jnp.abs(logits_res - logits))) < 0.1
    assert float(jnp.max(jnp.abs(logits_red - logits))) < 0.1

    print("KERNEL_OK")
</pallas_src>

<mosaic_0001>
module attributes {stable_mosaic.version = 11 : i64} {
  func.func @_fused_forward_kernel(%arg0: memref<256x256xbf16, #tpu.memory_space<vmem>>, %arg1: memref<256x128xbf16, #tpu.memory_space<vmem>>, %arg2: memref<128x128xbf16, #tpu.memory_space<vmem>>, %arg3: memref<1x128xf32, #tpu.memory_space<vmem>>, %arg4: memref<128x128xbf16, #tpu.memory_space<vmem>>, %arg5: memref<1x128xf32, #tpu.memory_space<vmem>>, %arg6: memref<128x128xbf16, #tpu.memory_space<vmem>>, %arg7: memref<1x128xf32, #tpu.memory_space<vmem>>, %arg8: memref<256x128xf32, #tpu.memory_space<vmem>>) attributes {dimension_semantics = [], scalar_prefetch = 0 : i64, scratch_operands = 0 : i64, tpu.core_type = #tpu.core_type<tc>} {
    %c0 = arith.constant 0 : index
    %c0_0 = arith.constant 0 : index
    %0 = vector.load %arg0[%c0, %c0_0] : memref<256x256xbf16, #tpu.memory_space<vmem>>, vector<256x256xbf16>
    %c0_1 = arith.constant 0 : index
    %c0_2 = arith.constant 0 : index
    %1 = vector.load %arg1[%c0_1, %c0_2] : memref<256x128xbf16, #tpu.memory_space<vmem>>, vector<256x128xbf16>
    %c0_3 = arith.constant 0 : index
    %c0_4 = arith.constant 0 : index
    %2 = vector.load %arg2[%c0_3, %c0_4] : memref<128x128xbf16, #tpu.memory_space<vmem>>, vector<128x128xbf16>
    %cst = arith.constant dense<0.000000e+00> : vector<256x128xf32>
    %3 = tpu.matmul %1, %2, %cst {dimension_numbers = #tpu.dot_dimension_numbers<[1], [0], [0], [1], [0, 0, 1, 1], [], []>} : vector<256x128xbf16>, vector<128x128xbf16>, vector<256x128xf32> -> vector<256x128xf32>
    %4 = arith.truncf %3 : vector<256x128xf32> to vector<256x128xbf16>
    %cst_5 = arith.constant dense<0.000000e+00> : vector<256x128xf32>
    %5 = tpu.matmul %0, %4, %cst_5 {dimension_numbers = #tpu.dot_dimension_numbers<[1], [0], [0], [1], [0, 0, 1, 1], [], []>} : vector<256x256xbf16>, vector<256x128xbf16>, vector<256x128xf32> -> vector<256x128xf32>
    %c0_6 = arith.constant 0 : index
    %c0_7 = arith.constant 0 : index
    %6 = vector.load %arg3[%c0_6, %c0_7] : memref<1x128xf32, #tpu.memory_space<vmem>>, vector<1x128xf32>
    %7 = vector.broadcast %6 : vector<1x128xf32> to vector<256x128xf32>
    %8 = arith.addf %5, %7 : vector<256x128xf32>
    %cst_8 = arith.constant 0.000000e+00 : f32
    %9 = vector.broadcast %cst_8 : f32 to vector<256x128xf32>
    %10 = arith.maximumf %8, %9 : vector<256x128xf32>
    %11 = arith.truncf %10 : vector<256x128xf32> to vector<256x128xbf16>
    %c0_9 = arith.constant 0 : index
    %c0_10 = arith.constant 0 : index
    %12 = vector.load %arg4[%c0_9, %c0_10] : memref<128x128xbf16, #tpu.memory_space<vmem>>, vector<128x128xbf16>
    %cst_11 = arith.constant dense<0.000000e+00> : vector<256x128xf32>
    %13 = tpu.matmul %11, %12, %cst_11 {dimension_numbers = #tpu.dot_dimension_numbers<[1], [0], [0], [1], [0, 0, 1, 1], [], []>} : vector<256x128xbf16>, vector<128x128xbf16>, vector<256x128xf32> -> vector<256x128xf32>
    %14 = arith.truncf %13 : vector<256x128xf32> to vector<256x128xbf16>
    %cst_12 = arith.constant dense<0.000000e+00> : vector<256x128xf32>
    %15 = tpu.matmul %0, %14, %cst_12 {dimension_numbers = #tpu.dot_dimension_numbers<[1], [0], [0], [1], [0, 0, 1, 1], [], []>} : vector<256x256xbf16>, vector<256x128xbf16>, vector<256x128xf32> -> vector<256x128xf32>
    %c0_13 = arith.constant 0 : index
    %c0_14 = arith.constant 0 : index
    %16 = vector.load %arg5[%c0_13, %c0_14] : memref<1x128xf32, #tpu.memory_space<vmem>>, vector<1x128xf32>
    %17 = vector.broadcast %16 : vector<1x128xf32> to vector<256x128xf32>
    %18 = arith.addf %15, %17 : vector<256x128xf32>
    %cst_15 = arith.constant 0.000000e+00 : f32
    %19 = vector.broadcast %cst_15 : f32 to vector<256x128xf32>
    %20 = arith.maximumf %18, %19 : vector<256x128xf32>
    %21 = arith.truncf %20 : vector<256x128xf32> to vector<256x128xbf16>
    %c0_16 = arith.constant 0 : index
    %c0_17 = arith.constant 0 : index
    %22 = vector.load %arg6[%c0_16, %c0_17] : memref<128x128xbf16, #tpu.memory_space<vmem>>, vector<128x128xbf16>
    %cst_18 = arith.constant dense<0.000000e+00> : vector<256x128xf32>
    %23 = tpu.matmul %21, %22, %cst_18 {dimension_numbers = #tpu.dot_dimension_numbers<[1], [0], [0], [1], [0, 0, 1, 1], [], []>} : vector<256x128xbf16>, vector<128x128xbf16>, vector<256x128xf32> -> vector<256x128xf32>
    %c0_19 = arith.constant 0 : index
    %c0_20 = arith.constant 0 : index
    %24 = vector.load %arg7[%c0_19, %c0_20] : memref<1x128xf32, #tpu.memory_space<vmem>>, vector<1x128xf32>
    %25 = vector.broadcast %24 : vector<1x128xf32> to vector<256x128xf32>
    %26 = arith.addf %23, %25 : vector<256x128xf32>
    %c0_21 = arith.constant 0 : index
    %c0_22 = arith.constant 0 : index
    %27 = vector.load %arg8[%c0_21, %c0_22] : memref<256x128xf32, #tpu.memory_space<vmem>>, vector<256x128xf32>
    tpu.vector_store %arg8[%c0_21, %c0_22], %26 {strides = array<i32>} : memref<256x128xf32, #tpu.memory_space<vmem>>, vector<256x128xf32>,
    return
  }
}

</mosaic_0001>

<bundles_post_ra>
// kernel: mul.2
= control target key start
LH: loop header
LB: loop body
LE: loop exit
PB: predicated region body
PF: predicated region fallthrough
CT: control target
= control target key end

     0   :  { %s34_s0 = inlined_call_operand.vmem [shape: f32[401], index: 0, kind: input, shape index: {}]   ;;  %s35_s1 = inlined_call_operand.vmem [shape: f32[401], index: 1, kind: input, shape index: {}]   ;;  %s36_s2 = inlined_call_operand.vmem [shape: f32[401], index: 2, kind: output, shape index: {}]  }
   0x1   :  { %v3_v0 = vld [vmem:[%s34_s0] sm:$0xf] }
   0x2   :  { %v4_v1 = vld [vmem:[%s35_s1] sm:$0xf] }
   0x3   :  { %v7_v2 = vmul.f32 %v4_v1, %v3_v0 }
   0x5   :  { %9 = vst [vmem:[%s36_s2] sm:$0xf] %v7_v2 }

// kernel: sentence_gnn_forward.1
= control target key start
LH: loop header
LB: loop body
LE: loop exit
PB: predicated region body
PF: predicated region fallthrough
CT: control target
= control target key end

     0   :  { %s2494_s2 = inlined_call_operand.vmem [shape: bf16[128,128], index: 2, kind: input, shape index: {}]   ;;  %s2495_s1 = inlined_call_operand.vmem [shape: bf16[256,128], index: 1, kind: input, shape index: {}]   ;;  %s2496_s0 = inlined_call_operand.vmem [shape: bf16[256,256], index: 0, kind: input, shape index: {}]   ;;  %s2497_s3 = inlined_call_operand.vmem [shape: f32[1,128], index: 3, kind: input, shape index: {}]   ;;  %s2498_s4 = inlined_call_operand.vmem [shape: bf16[128,128], index: 4, kind: input, shape index: {}]   ;;  %s2499_s6 = inlined_call_operand.vmem [shape: bf16[128,128], index: 6, kind: input, shape index: {}]   ;;  %s2500_s5 = inlined_call_operand.vmem [shape: f32[1,128], index: 5, kind: input, shape index: {}]   ;;  %s2501_s7 = inlined_call_operand.vmem [shape: f32[1,128], index: 7, kind: input, shape index: {}]   ;;  %s2502_s8 = inlined_call_operand.vmem [shape: f32[256,128], index: 8, kind: output, shape index: {}]  }
   0x1   :  { %v1683_v0 = vld [vmem:[%s2494_s2 + $0x38] sm:$0xff]  ;;  %v1682_v1 = vld [vmem:[%s2494_s2 + $0x30] sm:$0xff]  ;;  %v1681_v2 = vld [vmem:[%s2494_s2 + $0x28] sm:$0xff] }
   0x2   :  { %253 = vmatpush.bf16.msra.mxu0 %v1683_v0  ;;  %1700 = vmatpush.bf16.msra.mxu3 %v1683_v0  ;;  %v1680_v3 = vld [vmem:[%s2494_s2 + $0x20] sm:$0xff]  ;;  %v1679_v4 = vld [vmem:[%s2494_s2 + $0x18] sm:$0xff]  ;;  %v1678_v5 = vld [vmem:[%s2494_s2 + $0x10] sm:$0xff] }
   0x3   :  { %v1677_v6 = vld [vmem:[%s2494_s2 + $0x8] sm:$0xff]  ;;  %v1676_v7 = vld [vmem:[%s2494_s2] sm:$0xff]  ;;  %v1662_v12 = vld [vmem:[%s2495_s1 + $0x10] sm:$0xff] }
   0x4   :  { %v1660_v8 = vld [vmem:[%s2495_s1] sm:$0xff]  ;;  %v1661_v10 = vld [vmem:[%s2495_s1 + $0x8] sm:$0xff]  ;;  %v1674_v13 = vld [vmem:[%s2495_s1 + $0x70] sm:$0xff] }
   0x5   :  { %v1672_v9 = vld [vmem:[%s2495_s1 + $0x60] sm:$0xff]  ;;  %v1673_v11 = vld [vmem:[%s2495_s1 + $0x68] sm:$0xff]  ;;  %v1663_v14 = vld [vmem:[%s2495_s1 + $0x18] sm:$0xff] }
   0x6   :  { %254 = vmatpush.bf16.msra.mxu0 %v1682_v1  ;;  %1701 = vmatpush.bf16.msra.mxu3 %v1682_v1  ;;  %v1675_v15 = vld [vmem:[%s2495_s1 + $0x78] sm:$0xff]  ;;  %v1664_v16 = vld [vmem:[%s2495_s1 + $0x20] sm:$0xff]  ;;  %v1665_v17 = vld [vmem:[%s2495_s1 + $0x28] sm:$0xff] }
   0x7   :  { %v1666_v18 = vld [vmem:[%s2495_s1 + $0x30] sm:$0xff]  ;;  %v1667_v19 = vld [vmem:[%s2495_s1 + $0x38] sm:$0xff]  ;;  %v1668_v20 = vld [vmem:[%s2495_s1 + $0x40] sm:$0xff] }
   0x8   :  { %v1669_v24 = vld [vmem:[%s2495_s1 + $0x48] sm:$0xff]  ;;  %v1670_v29 = vld [vmem:[%s2495_s1 + $0x50] sm:$0xff]  ;;  %v1671_v34 = vld [vmem:[%s2495_s1 + $0x58] sm:$0xff] }
   0x9   :  { %v1534_v62 = vld [vmem:[%s2496_s0 + $0xc0] sm:$0xf]  ;;  %v1653_v63 = vld [vmem:[%s2496_s0 + $0xc4] sm:$0xf0] }
   0xa   :  { %255 = vmatpush.bf16.msra.mxu0 %v1681_v2  ;;  %1702 = vmatpush.bf16.msra.mxu3 %v1681_v2  ;;  %v1858_v1 = vor.u32 %v1653_v63, %v1534_v62  ;;  %v1560_v62 = vld [vmem:[%s2496_s0 + $0xf8] sm:$0xf0]  ;;  %v1486_v63 = vld [vmem:[%s2496_s0 + $0x60] sm:$0xf] }
   0xe   :  { %256 = vmatpush.bf16.msra.mxu0 %v1680_v3  ;;  %1703 = vmatpush.bf16.msra.mxu3 %v1680_v3 }
  0x12   :  { %257 = vmatpush.bf16.msra.mxu0 %v1679_v4  ;;  %1704 = vmatpush.bf16.msra.mxu3 %v1679_v4  ;;  %v1542_v4 = vld [vmem:[%s2496_s0 + $0xd0] sm:$0xf] }
  0x16   :  { %258 = vmatpush.bf16.msra.mxu0 %v1678_v5  ;;  %1705 = vmatpush.bf16.msra.mxu3 %v1678_v5  ;;  %v1655_v5 = vld [vmem:[%s2496_s0 + $0xd4] sm:$0xf0] }
  0x1a   :  { %259 = vmatpush.bf16.msra.mxu0 %v1677_v6  ;;  %1706 = vmatpush.bf16.msra.mxu3 %v1677_v6  ;;  %v1438_v6 = vld [vmem:[%s2496_s0] sm:$0xf] }
  0x1e   :  { %260 = vmatpush.bf16.msra.mxu0 %v1676_v7  ;;  %1707 = vmatpush.bf16.msra.mxu3 %v1676_v7  ;;  %v1629_v7 = vld [vmem:[%s2496_s0 + $0x4] sm:$0xf0] }
  0x21   :  { %261 = vmatmul.bf16.vlgmr.msra.gmra.mxu0 %v1660_v8  ;;  %321 = vmatmul.bf16.vlgmr.msra.gmra.mxu3 %v1672_v9  ;;  %v1873_v8 = vor.u32 %v1629_v7, %v1438_v6  ;;  %v1875_v9 = vor.u32 %v1655_v5, %v1542_v4  ;;  %v1638_v5 = vld [vmem:[%s2496_s0 + $0x54] sm:$0xf]  ;;  %v1480_v6 = vld [vmem:[%s2496_s0 + $0x58] sm:$0xf0]  ;;  %v1494_v7 = vld [vmem:[%s2496_s0 + $0x70] sm:$0xf] }
  0x31   :  { %266 = vmatmul.bf16.gmra.mxu0 %v1661_v10  ;;  %326 = vmatmul.bf16.gmra.mxu3 %v1673_v11  ;;  %v1446_v11 = vld [vmem:[%s2496_s0 + $0x10] sm:$0xf] }
  0x41   :  { %271 = vmatmul.bf16.gmra.mxu0 %v1662_v12  ;;  %331 = vmatmul.bf16.gmra.mxu3 %v1674_v13  ;;  %v1631_v12 = vld [vmem:[%s2496_s0 + $0x14] sm:$0xf0] }
  0x51   :  { %276 = vmatmul.bf16.gmra.mxu0 %v1663_v14  ;;  %336 = vmatmul.bf16.gmra.mxu3 %v1675_v15  ;;  %v1885_v14 = vor.u32 %v1631_v12, %v1446_v11  ;;  %v1550_v15 = vld [vmem:[%s2496_s0 + $0xe0] sm:$0xf]  ;;  %v2047_v12 = vor.u32 %v1638_v5, %v1480_v6 }
  0x61   :  { %281 = vmatmul.bf16.gmra.mxu0 %v1664_v16  ;;  %v1657_v16 = vld [vmem:[%s2496_s0 + $0xe4] sm:$0xf0] }
  0x71   :  { %286 = vmatmul.bf16.gmra.mxu0 %v1665_v17  ;;  %v1893_v17 = vor.u32 %v1657_v16, %v1550_v15  ;;  %v1690_v16 = vld [vmem:[%s2498_s4 + $0x30] sm:$0xff] }
  0x81   :  { %291 = vmatmul.bf16.gmra.mxu0 %v1666_v18 }
  0x91   :  { %296 = vmatmul.bf16.gmra.mxu0 %v1667_v19 }
  0x9e   :  { %v1835_v21 = vpop.f32.mrf.mxu0 }
  0xa1   :  { %301 = vmatmul.bf16.gmra.mxu0 %v1668_v20 }
  0xa4   :  { %v322_v23 = vpop.f32.mrf.mxu3 }
  0xa6   :  { %v1837_v22 = vpop.f32.mrf.mxu0 }
  0xa7   :  { %v342_v0 = vpack.c.bf16 %v1837_v22, %v1835_v21  ;;  %v1454_v21 = vld [vmem:[%s2496_s0 + $0x20] sm:$0xf]  ;;  %v1633_v22 = vld [vmem:[%s2496_s0 + $0x24] sm:$0xf0] }
  0xac   :  { %v324_v26 = vpop.f32.mrf.mxu3 }
  0xad   :  { %v354_v46 = vpack.c.bf16 %v324_v26, %v322_v23  ;;  %v1659_v26 = vld [vmem:[%s2496_s0 + $0xf4] sm:$0xf0] }
  0xae   :  { %v267_v25 = vpop.f32.mrf.mxu0 }
  0xb1   :  { %306 = vmatmul.bf16.gmra.mxu0 %v1669_v24  ;;  %v1558_v24 = vld [vmem:[%s2496_s0 + $0xf0] sm:$0xf] }
  0xb4   :  { %v327_v28 = vpop.f32.mrf.mxu3 }
  0xb6   :  { %v269_v27 = vpop.f32.mrf.mxu0 }
  0xb7   :  { %v343_v61 = vpack.c.bf16 %v269_v27, %v267_v25  ;;  %v1906_v25 = vor.u32 %v1633_v22, %v1454_v21  ;;  %v1628_v27 = vld [vmem:[%s2496_s0 + $0x4] sm:$0xf]  ;;  %v1689_v21 = vld [vmem:[%s2498_s4 + $0x28] sm:$0xff]  ;;  %v1502_v22 = vld [vmem:[%s2496_s0 + $0x80] sm:$0xf] }
  0xbc   :  { %v329_v31 = vpop.f32.mrf.mxu3 }
  0xbd   :  { %v355_v44 = vpack.c.bf16 %v329_v31, %v327_v28  ;;  %v1440_v28 = vld [vmem:[%s2496_s0 + $0x8] sm:$0xf0] }
  0xbe   :  { %v272_v30 = vpop.f32.mrf.mxu0  ;;  %v1920_v31 = vor.u32 %v1628_v27, %v1440_v28  ;;  %v1688_v28 = vld [vmem:[%s2498_s4 + $0x20] sm:$0xff] }
  0xc1   :  { %311 = vmatmul.bf16.gmra.mxu0 %v1670_v29 }
  0xc4   :  { %v332_v33 = vpop.f32.mrf.mxu3 }
  0xc6   :  { %v274_v32 = vpop.f32.mrf.mxu0 }
  0xc7   :  { %v344_v59 = vpack.c.bf16 %v274_v32, %v272_v30  ;;  %v1918_v30 = vor.u32 %v1659_v26, %v1558_v24  ;;  %v1462_v32 = vld [vmem:[%s2496_s0 + $0x30] sm:$0xf] }
  0xcc   :  { %v334_v36 = vpop.f32.mrf.mxu3 }
  0xcd   :  { %v356_v43 = vpack.c.bf16 %v334_v36, %v332_v33  ;;  %v1635_v33 = vld [vmem:[%s2496_s0 + $0x34] sm:$0xf0]  ;;  %v1448_v36 = vld [vmem:[%s2496_s0 + $0x18] sm:$0xf0] }
  0xce   :  { %v277_v35 = vpop.f32.mrf.mxu0 }
  0xd1   :  { %316 = vmatmul.bf16.gmra.mxu0 %v1671_v34  ;;  %v1630_v34 = vld [vmem:[%s2496_s0 + $0x14] sm:$0xf] }
  0xd4   :  { %v337_v38 = vpop.f32.mrf.mxu3 }
  0xd6   :  { %v279_v37 = vpop.f32.mrf.mxu0 }
  0xd7   :  { %v345_v58 = vpack.c.bf16 %v279_v37, %v277_v35  ;;  %v1934_v35 = vor.u32 %v1635_v33, %v1462_v32  ;;  %v1652_v37 = vld [vmem:[%s2496_s0 + $0xc4] sm:$0xf]  ;;  %v1687_v32 = vld [vmem:[%s2498_s4 + $0x18] sm:$0xff] }
  0xdc   :  { %v339_v40 = vpop.f32.mrf.mxu3 }
  0xdd   :  { %v357_v41 = vpack.c.bf16 %v339_v40, %v337_v38  ;;  %v1536_v38 = vld [vmem:[%s2496_s0 + $0xc8] sm:$0xf0] }
  0xde   :  { %v282_v39 = vpop.f32.mrf.mxu0  ;;  %v1947_v40 = vor.u32 %v1652_v37, %v1536_v38  ;;  %v1496_v37 = vld [vmem:[%s2496_s0 + $0x78] sm:$0xf0] }
  0xdf   :  { %611 = vmatpush.bf16.msra.mxu2 %v357_v41 }
  0xe0   :  { %2507 = vst [vmem:[#allocation2_spill] sm:$0xff] %v1947_v40 }
  0xe3   :  { %612 = vmatpush.bf16.msra.mxu2 %v356_v43 }
  0xe6   :  { %v284_v42 = vpop.f32.mrf.mxu0 }
  0xe7   :  { %613 = vmatpush.bf16.msra.mxu2 %v355_v44  ;;  %v346_v56 = vpack.c.bf16 %v284_v42, %v282_v39  ;;  %v1945_v39 = vor.u32 %v1630_v34, %v1448_v36  ;;  %v1637_v42 = vld [vmem:[%s2496_s0 + $0x44] sm:$0xf0]  ;;  %v1686_v34 = vld [vmem:[%s2498_s4 + $0x10] sm:$0xff] }
  0xe8   :  { %v1642_v36 = vld [vmem:[%s2496_s0 + $0x74] sm:$0xf] }
  0xeb   :  { %614 = vmatpush.bf16.msra.mxu2 %v354_v46 }
  0xee   :  { %v287_v45 = vpop.f32.mrf.mxu0 }
  0xf6   :  { %v289_v47 = vpop.f32.mrf.mxu0 }
  0xf7   :  { %v347_v55 = vpack.c.bf16 %v289_v47, %v287_v45  ;;  %v1456_v45 = vld [vmem:[%s2496_s0 + $0x28] sm:$0xf0]  ;;  %v1544_v47 = vld [vmem:[%s2496_s0 + $0xd8] sm:$0xf0] }
  0xfe   :  { %v292_v48 = vpop.f32.mrf.mxu0 }
 0x106   :  { %v294_v49 = vpop.f32.mrf.mxu0 }
 0x107   :  { %v348_v53 = vpack.c.bf16 %v294_v49, %v292_v48 }
 0x10e   :  { %v297_v50 = vpop.f32.mrf.mxu0 }
 0x116   :  { %v299_v51 = vpop.f32.mrf.mxu0 }
 0x117   :  { %v349_v52 = vpack.c.bf16 %v299_v51, %v297_v50  ;;  %v1478_v50 = vld [vmem:[%s2496_s0 + $0x50] sm:$0xf]  ;;  %v1639_v51 = vld [vmem:[%s2496_s0 + $0x54] sm:$0xf0] }
 0x119   :  { %522 = vmatpush.bf16.msra.mxu1 %v349_v52  ;;  %1708 = vmatpush.bf16.msrb.mxu3 %v349_v52  ;;  %v1634_v52 = vld [vmem:[%s2496_s0 + $0x34] sm:$0xf] }
 0x11d   :  { %523 = vmatpush.bf16.msra.mxu1 %v348_v53  ;;  %1709 = vmatpush.bf16.msrb.mxu3 %v348_v53  ;;  %v1988_v53 = vor.u32 %v1639_v51, %v1478_v50  ;;  %v1684_v50 = vld [vmem:[%s2498_s4] sm:$0xff] }
 0x11e   :  { %v1848_v54 = vpop.f32.mrf.mxu0 }
 0x121   :  { %524 = vmatpush.bf16.msra.mxu1 %v347_v55  ;;  %1710 = vmatpush.bf16.msrb.mxu3 %v347_v55  ;;  %v1656_v55 = vld [vmem:[%s2496_s0 + $0xe4] sm:$0xf] }
 0x125   :  { %525 = vmatpush.bf16.msra.mxu1 %v346_v56  ;;  %1711 = vmatpush.bf16.msrb.mxu3 %v346_v56  ;;  %v1552_v56 = vld [vmem:[%s2496_s0 + $0xe8] sm:$0xf0] }
 0x126   :  { %v304_v57 = vpop.f32.mrf.mxu0 }
 0x127   :  { %v350_v29 = vpack.c.bf16 %v304_v57, %v1848_v54  ;;  %v1464_v54 = vld [vmem:[%s2496_s0 + $0x38] sm:$0xf0] }
 0x128   :  { %v1999_v57 = vor.u32 %v1634_v52, %v1464_v54  ;;  %v1644_v54 = vld [vmem:[%s2496_s0 + $0x84] sm:$0xf] }
 0x129   :  { %526 = vmatpush.bf16.msra.mxu1 %v345_v58  ;;  %1712 = vmatpush.bf16.msrb.mxu3 %v345_v58  ;;  %v2001_v58 = vor.u32 %v1656_v55, %v1552_v56  ;;  %v1504_v55 = vld [vmem:[%s2496_s0 + $0x88] sm:$0xf0] }
 0x12b   :  { %2509 = vst [vmem:[#allocation4_spill] sm:$0xff] %v2001_v58 }
 0x12d   :  { %527 = vmatpush.bf16.msra.mxu1 %v344_v59  ;;  %1713 = vmatpush.bf16.msrb.mxu3 %v344_v59  ;;  %v1636_v59 = vld [vmem:[%s2496_s0 + $0x44] sm:$0xf] }
 0x12e   :  { %v307_v60 = vpop.f32.mrf.mxu0 }
 0x131   :  { %528 = vmatpush.bf16.msra.mxu1 %v343_v61  ;;  %1714 = vmatpush.bf16.msrb.mxu3 %v343_v61  ;;  %v1658_v61 = vld [vmem:[%s2496_s0 + $0xf4] sm:$0xf] }
 0x132   :  { %v2028_v4 = vor.u32 %v1658_v61, %v1560_v62 }
 0x134   :  { %2510 = vst [vmem:[#allocation5_spill] sm:$0xff] %v2028_v4 }
 0x135   :  { %529 = vmatpush.bf16.msra.mxu1 %v342_v0  ;;  %1715 = vmatpush.bf16.msrb.mxu3 %v342_v0  ;;  %v1641_v0 = vld [vmem:[%s2496_s0 + $0x64] sm:$0xf0] }
 0x136   :  { %v309_v2 = vpop.f32.mrf.mxu0 }
 0x137   :  { %v351_v23 = vpack.c.bf16 %v309_v2, %v307_v60  ;;  %v1472_v60 = vld [vmem:[%s2496_s0 + $0x48] sm:$0xf0]  ;;  %v2024_v2 = vor.u32 %v1641_v0, %v1486_v63  ;;  %v2137_v63 = vor.u32 %v1644_v54, %v1504_v55  ;;  %v2144_v0 = vld [vmem:[%s2497_s3] ss:$0 sm:$0xff] }
 0x138   :  { %590 = vmatmul.bf16.vlgmr.msrb.gmra.mxu3 %v1858_v1  ;;  %530 = vmatmul.bf16.vlgmr.msra.gmra.mxu1 %v1873_v8 }
 0x139   :  { %1716 = vmatpush.bf16.msra.mxu3 %v357_v41  ;;  %v1470_v41 = vld [vmem:[%s2496_s0 + $0x40] sm:$0xf] }
 0x13d   :  { %1717 = vmatpush.bf16.msra.mxu3 %v356_v43  ;;  %v1632_v43 = vld [vmem:[%s2496_s0 + $0x24] sm:$0xf] }
 0x13e   :  { %v312_v3 = vpop.f32.mrf.mxu0  ;;  %v1972_v48 = vor.u32 %v1632_v43, %v1456_v45  ;;  %v1647_v43 = vld [vmem:[%s2496_s0 + $0x94] sm:$0xf0] }
 0x141   :  { %1718 = vmatpush.bf16.msra.mxu3 %v355_v44  ;;  %v1961_v44 = vor.u32 %v1637_v42, %v1470_v41  ;;  %v1685_v41 = vld [vmem:[%s2498_s4 + $0x8] sm:$0xff]  ;;  %v1510_v42 = vld [vmem:[%s2496_s0 + $0x90] sm:$0xf] }
 0x142   :  { %v2108_v45 = vor.u32 %v1647_v43, %v1510_v42 }
 0x145   :  { %1719 = vmatpush.bf16.msra.mxu3 %v354_v46  ;;  %v1654_v46 = vld [vmem:[%s2496_s0 + $0xd4] sm:$0xf] }
 0x146   :  { %v314_v10 = vpop.f32.mrf.mxu0  ;;  %v1974_v49 = vor.u32 %v1654_v46, %v1544_v47  ;;  %v2112_v47 = vor.u32 %v1642_v36, %v1496_v37 }
 0x147   :  { %v352_v20 = vpack.c.bf16 %v314_v10, %v312_v3  ;;  %v2026_v3 = vor.u32 %v1636_v59, %v1472_v60  ;;  %v1643_v10 = vld [vmem:[%s2496_s0 + $0x74] sm:$0xf0]  ;;  %v1518_v59 = vld [vmem:[%s2496_s0 + $0xa0] sm:$0xf]  ;;  %v1649_v60 = vld [vmem:[%s2496_s0 + $0xa4] sm:$0xf0] }
 0x148   :  { %595 = vmatmul.bf16.gmra.mxu3 %v1875_v9  ;;  %535 = vmatmul.bf16.gmra.mxu1 %v1885_v14  ;;  %2508 = vst [vmem:[#allocation3_spill] sm:$0xff] %v1974_v49  ;;  %v2045_v11 = vor.u32 %v1643_v10, %v1494_v7  ;;  %v2133_v61 = vor.u32 %v1649_v60, %v1518_v59  ;;  %v1648_v60 = vld [vmem:[%s2496_s0 + $0xa4] sm:$0xf] }
 0x14e   :  { %v317_v13 = vpop.f32.mrf.mxu0 }
 0x156   :  { %v319_v18 = vpop.f32.mrf.mxu0 }
 0x157   :  { %v353_v19 = vpack.c.bf16 %v319_v18, %v317_v13  ;;  %v1691_v13 = vld [vmem:[%s2498_s4 + $0x38] sm:$0xff]  ;;  %v1640_v18 = vld [vmem:[%s2496_s0 + $0x64] sm:$0xf] }
 0x158   :  { %600 = vmatmul.bf16.gmra.mxu3 %v1893_v17  ;;  %540 = vmatmul.bf16.gmra.mxu1 %v1906_v25 }
 0x159   :  { %615 = vmatpush.bf16.msra.mxu2 %v353_v19  ;;  %1720 = vmatpush.bf16.msra.mxu3 %v353_v19  ;;  %v1488_v19 = vld [vmem:[%s2496_s0 + $0x68] sm:$0xf0] }
 0x15a   :  { %v2078_v27 = vor.u32 %v1640_v18, %v1488_v19  ;;  %v1526_v18 = vld [vmem:[%s2496_s0 + $0xb0] sm:$0xf]  ;;  %v1651_v19 = vld [vmem:[%s2496_s0 + $0xb4] sm:$0xf0] }
 0x15d   :  { %616 = vmatpush.bf16.msra.mxu2 %v352_v20  ;;  %1721 = vmatpush.bf16.msra.mxu3 %v352_v20 }
 0x161   :  { %617 = vmatpush.bf16.msra.mxu2 %v351_v23  ;;  %1722 = vmatpush.bf16.msra.mxu3 %v351_v23  ;;  %v1645_v23 = vld [vmem:[%s2496_s0 + $0x84] sm:$0xf0] }
 0x162   :  { %v2074_v24 = vor.u32 %v1645_v23, %v1502_v22 }
 0x165   :  { %618 = vmatpush.bf16.msra.mxu2 %v350_v29  ;;  %1723 = vmatpush.bf16.msra.mxu3 %v350_v29 }
 0x168   :  { %605 = vmatmul.bf16.gmra.mxu3 %v1918_v30  ;;  %619 = vmatmul.bf16.vlgmr.msra.gmra.mxu2 %v1920_v31 }
 0x169   :  { %545 = vmatmul.bf16.gmra.mxu1 %v1934_v35  ;;  %812 = vmatpush.bf16.msrb.mxu3 %v1691_v13  ;;  %v1646_v13 = vld [vmem:[%s2496_s0 + $0x94] sm:$0xf] }
 0x16d   :  { %813 = vmatpush.bf16.msrb.mxu3 %v1690_v16  ;;  %v1512_v16 = vld [vmem:[%s2496_s0 + $0x98] sm:$0xf0] }
 0x171   :  { %814 = vmatpush.bf16.msrb.mxu3 %v1689_v21 }
 0x175   :  { %815 = vmatpush.bf16.msrb.mxu3 %v1688_v28 }
 0x178   :  { %624 = vmatmul.bf16.gmra.mxu2 %v1945_v39  ;;  %679 = vmatmul.bf16.vlgmr.msra.gmra.mxu3 %v1947_v40 }
 0x179   :  { %550 = vmatmul.bf16.gmra.mxu1 %v1961_v44  ;;  %816 = vmatpush.bf16.msrb.mxu3 %v1687_v32 }
 0x17d   :  { %817 = vmatpush.bf16.msrb.mxu3 %v1686_v34  ;;  %v2166_v34 = vor.u32 %v1646_v13, %v1512_v16 }
 0x181   :  { %818 = vmatpush.bf16.msrb.mxu3 %v1685_v41 }
 0x185   :  { %819 = vmatpush.bf16.msrb.mxu3 %v1684_v50 }
 0x188   :  { %629 = vmatmul.bf16.gmra.mxu2 %v1972_v48  ;;  %684 = vmatmul.bf16.gmra.mxu3 %v1974_v49 }
 0x189   :  { %555 = vmatmul.bf16.gmra.mxu1 %v1988_v53 }
 0x198   :  { %634 = vmatmul.bf16.gmra.mxu2 %v1999_v57  ;;  %689 = vmatmul.bf16.gmra.mxu3 %v2001_v58 }
 0x199   :  { %560 = vmatmul.bf16.gmra.mxu1 %v2024_v2 }
 0x1a8   :  { %639 = vmatmul.bf16.gmra.mxu2 %v2026_v3  ;;  %694 = vmatmul.bf16.gmra.mxu3 %v2028_v4 }
 0x1a9   :  { %565 = vmatmul.bf16.gmra.mxu1 %v2045_v11 }
 0x1b5   :  { %v531_v20 = vpop.f32.mrf.mxu1 }
 0x1b6   :  { %v532_v10 = vadd.f32 %v2144_v0, %v531_v20  ;;  %v2162_v20 = vor.u32 %v1651_v19, %v1526_v18 }
 0x1b8   :  { %644 = vmatmul.bf16.gmra.mxu2 %v2047_v12 }
 0x1b9   :  { %570 = vmatmul.bf16.gmra.mxu1 %v2074_v24 }
 0x1bb   :  { %v2054_v15 = vpop.f32.mrf.mxu3 }
 0x1bc   :  { %v592_v42 = vadd.f32 %v2144_v0, %v2054_v15 }
 0x1bd   :  { %v533_v29 = vpop.f32.mrf.mxu1 }
 0x1be   :  { %v534_v21 = vadd.f32 %v2144_v0, %v533_v29 }
 0x1c3   :  { %v2076_v26 = vpop.f32.mrf.mxu3 }
 0x1c5   :  { %v536_v38 = vpop.f32.mrf.mxu1 }
 0x1c6   :  { %v537_v55 = vadd.f32 %v2144_v0, %v536_v38 }
 0x1c8   :  { %649 = vmatmul.bf16.gmra.mxu2 %v2078_v27 }
 0x1c9   :  { %575 = vmatmul.bf16.gmra.mxu1 %v2108_v45 }
 0x1cb   :  { %v2088_v33 = vpop.f32.mrf.mxu3 }
 0x1cd   :  { %v538_v51 = vpop.f32.mrf.mxu1 }
 0x1ce   :  { %v539_v15 = vadd.f32 %v2144_v0, %v538_v51 }
 0x1d3   :  { %v2110_v46 = vpop.f32.mrf.mxu3 }
 0x1d5   :  { %v541_v56 = vpop.f32.mrf.mxu1 }
 0x1d8   :  { %654 = vmatmul.bf16.gmra.mxu2 %v2112_v47 }
 0x1d9   :  { %580 = vmatmul.bf16.gmra.mxu1 %v2133_v61 }
 0x1db   :  { %v2119_v52 = vpop.f32.mrf.mxu3 }
 0x1dd   :  { %v543_v5 = vpop.f32.mrf.mxu1 }
 0x1e3   :  { %v2135_v62 = vpop.f32.mrf.mxu3 }
 0x1e6   :  { %v546_v36 = vpop.f32.mrf.mxu1 }
 0x1e8   :  { %659 = vmatmul.bf16.gmra.mxu2 %v2137_v63 }
 0x1e9   :  { %585 = vmatmul.bf16.gmra.mxu1 %v2162_v20 }
 0x1eb   :  { %v2146_v6 = vpop.f32.mrf.mxu3  ;;  %v620_v7 = vpop.f32.mrf.mxu2 }
 0x1ec   :  { %v621_v22 = vadd.f32 %v620_v7, %v532_v10  ;;  %v1520_v7 = vld [vmem:[%s2496_s0 + $0xa8] sm:$0xf0] }
 0x1ed   :  { %v2184_v19 = vor.u32 %v1648_v60, %v1520_v7 }
 0x1ee   :  { %v700_v37 = vmax.f32 %v621_v22, 0.0  ;;  %v548_v59 = vpop.f32.mrf.mxu1  ;;  %v597_v22 = vadd.f32 %v2144_v0, %v2088_v33  ;;  %v544_v33 = vadd.f32 %v2144_v0, %v543_v5 }
 0x1f3   :  { %v2164_v23 = vpop.f32.mrf.mxu3  ;;  %v622_v28 = vpop.f32.mrf.mxu2 }
 0x1f4   :  { %v623_v32 = vadd.f32 %v622_v28, %v534_v21 }
 0x1f6   :  { %v701_v41 = vmax.f32 %v623_v32, 0.0  ;;  %v551_v32 = vpop.f32.mrf.mxu1 }
 0x1f8   :  { %v732_v43 = vpack.c.bf16 %v701_v41, %v700_v37  ;;  %664 = vmatmul.bf16.gmra.mxu2 %v2166_v34 }
 0x1fa   :  { %820 = vmatmul.bf16.vlgmr.msrb.gmra.mxu3 %v732_v43  ;;  %v1650_v43 = vld [vmem:[%s2496_s0 + $0xb4] sm:$0xf] }
 0x1fb   :  { %v625_v29 = vpop.f32.mrf.mxu2  ;;  %v680_v50 = vpop.f32.mrf.mxu3 }
 0x1fc   :  { %v2172_v54 = vadd.f32 %v680_v50, %v592_v42  ;;  %v626_v10 = vadd.f32 %v625_v29, %v537_v55  ;;  %v542_v42 = vadd.f32 %v2144_v0, %v541_v56  ;;  %v1528_v29 = vld [vmem:[%s2496_s0 + $0xb8] sm:$0xf0] }
 0x1fe   :  { %v702_v21 = vmax.f32 %v626_v10, 0.0  ;;  %v553_v55 = vpop.f32.mrf.mxu1  ;;  %v2201_v10 = vor.u32 %v1650_v43, %v1528_v29 }
 0x203   :  { %v627_v13 = vpop.f32.mrf.mxu2  ;;  %v2182_v16 = vpop.f32.mrf.mxu3 }
 0x204   :  { %v628_v18 = vadd.f32 %v627_v13, %v539_v15 }
 0x206   :  { %v703_v38 = vmax.f32 %v628_v18, 0.0  ;;  %v602_v18 = vadd.f32 %v2144_v0, %v2119_v52 }
 0x208   :  { %669 = vmatmul.bf16.gmra.mxu2 %v2184_v19  ;;  %v733_v28 = vpack.c.bf16 %v703_v38, %v702_v21 }
 0x20a   :  { %825 = vmatmul.bf16.gmra.mxu3 %v733_v28  ;;  %v556_v28 = vpop.f32.mrf.mxu1 }
 0x20b   :  { %v630_v37 = vpop.f32.mrf.mxu2  ;;  %v685_v41 = vpop.f32.mrf.mxu3 }
 0x20c   :  { %v2189_v51 = vadd.f32 %v685_v41, %v597_v22  ;;  %v631_v50 = vadd.f32 %v630_v37, %v542_v42  ;;  %v547_v37 = vadd.f32 %v2144_v0, %v546_v36  ;;  %v549_v41 = vadd.f32 %v2144_v0, %v548_v59 }
 0x20d   :  { %v552_v36 = vadd.f32 %v2144_v0, %v551_v32 }
 0x20e   :  { %v704_v13 = vmax.f32 %v631_v50, 0.0 }
 0x213   :  { %v632_v60 = vpop.f32.mrf.mxu2  ;;  %v2199_v7 = vpop.f32.mrf.mxu3 }
 0x214   :  { %v633_v15 = vadd.f32 %v632_v60, %v544_v33  ;;  %v558_v60 = vpop.f32.mrf.mxu1 }
 0x216   :  { %v705_v56 = vmax.f32 %v633_v15, 0.0  ;;  %v607_v15 = vadd.f32 %v2144_v0, %v2146_v6 }
 0x218   :  { %674 = vmatmul.bf16.gmra.mxu2 %v2201_v10  ;;  %v734_v21 = vpack.c.bf16 %v705_v56, %v704_v13 }
 0x21a   :  { %830 = vmatmul.bf16.gmra.mxu3 %v734_v21 }
 0x21b   :  { %v635_v38 = vpop.f32.mrf.mxu2  ;;  %v690_v22 = vpop.f32.mrf.mxu3 }
 0x21c   :  { %v2206_v5 = vadd.f32 %v690_v22, %v602_v18  ;;  %v636_v42 = vadd.f32 %v635_v38, %v547_v37  ;;  %v561_v59 = vpop.f32.mrf.mxu1  ;;  %v554_v38 = vadd.f32 %v2144_v0, %v553_v55 }
 0x21e   :  { %v706_v50 = vmax.f32 %v636_v42, 0.0 }
 0x223   :  { %v637_v43 = vpop.f32.mrf.mxu2  ;;  %v2210_v29 = vpop.f32.mrf.mxu3 }
 0x224   :  { %v638_v33 = vadd.f32 %v637_v43, %v549_v41  ;;  %v563_v6 = vpop.f32.mrf.mxu1 }
 0x226   :  { %v707_v52 = vmax.f32 %v638_v33, 0.0 }
 0x228   :  { %v735_v13 = vpack.c.bf16 %v707_v52, %v706_v50  ;;  %v557_v50 = vadd.f32 %v2144_v0, %v556_v28  ;;  %v559_v52 = vadd.f32 %v2144_v0, %v558_v60 }
 0x22a   :  { %835 = vmatmul.bf16.gmra.mxu3 %v735_v13 }
 0x22b   :  { %v640_v56 = vpop.f32.mrf.mxu2  ;;  %v695_v18 = vpop.f32.mrf.mxu3 }
 0x22c   :  { %v2214_v21 = vadd.f32 %v695_v18, %v607_v15  ;;  %v641_v22 = vadd.f32 %v640_v56, %v552_v36  ;;  %v566_v32 = vpop.f32.mrf.mxu1  ;;  %v562_v36 = vadd.f32 %v2144_v0, %v561_v59 }
 0x22e   :  { %v708_v42 = vmax.f32 %v641_v22, 0.0  ;;  %v564_v22 = vadd.f32 %v2144_v0, %v563_v6 }
 0x233   :  { %v642_v37 = vpop.f32.mrf.mxu2 }
 0x234   :  { %v643_v41 = vadd.f32 %v642_v37, %v554_v38  ;;  %v568_v38 = vpop.f32.mrf.mxu1 }
 0x236   :  { %v709_v43 = vmax.f32 %v643_v41, 0.0 }
 0x238   :  { %v736_v33 = vpack.c.bf16 %v709_v43, %v708_v42 }
 0x23a   :  { %840 = vmatmul.bf16.gmra.mxu3 %v736_v33 }
 0x23b   :  { %v645_v4 = vpop.f32.mrf.mxu2 }
 0x23c   :  { %v646_v15 = vadd.f32 %v645_v4, %v557_v50  ;;  %v571_v4 = vpop.f32.mrf.mxu1  ;;  %v567_v50 = vadd.f32 %v2144_v0, %v566_v32  ;;  %v2226_v32 = vpop.f32.mrf.mxu3 }
 0x23e   :  { %v710_v58 = vmax.f32 %v646_v15, 0.0 }
 0x243   :  { %v647_v13 = vpop.f32.mrf.mxu2 }
 0x244   :  { %v648_v18 = vadd.f32 %v647_v13, %v559_v52  ;;  %v573_v15 = vpop.f32.mrf.mxu1 }
 0x246   :  { %v711_v49 = vmax.f32 %v648_v18, 0.0 }
 0x248   :  { %v737_v55 = vpack.c.bf16 %v711_v49, %v710_v58  ;;  %v569_v49 = vadd.f32 %v2144_v0, %v568_v38 }
 0x24a   :  { %845 = vmatmul.bf16.gmra.mxu3 %v737_v55 }
 0x24b   :  { %v650_v56 = vpop.f32.mrf.mxu2 }
 0x24c   :  { %v651_v37 = vadd.f32 %v650_v56, %v562_v36  ;;  %v576_v56 = vpop.f32.mrf.mxu1  ;;  %v572_v36 = vadd.f32 %v2144_v0, %v571_v4 }
 0x24e   :  { %v712_v28 = vmax.f32 %v651_v37, 0.0 }
 0x253   :  { %v652_v41 = vpop.f32.mrf.mxu2 }
 0x254   :  { %v653_v42 = vadd.f32 %v652_v41, %v564_v22  ;;  %v574_v22 = vadd.f32 %v2144_v0, %v573_v15 }
 0x256   :  { %v713_v43 = vmax.f32 %v653_v42, 0.0 }
 0x258   :  { %v738_v60 = vpack.c.bf16 %v713_v43, %v712_v28  ;;  %v578_v43 = vpop.f32.mrf.mxu1 }
 0x259   :  { %v579_v4 = vadd.f32 %v2144_v0, %v578_v43 }
 0x25a   :  { %850 = vmatmul.bf16.gmra.mxu3 %v738_v60 }
 0x25b   :  { %v655_v33 = vpop.f32.mrf.mxu2 }
 0x25c   :  { %v656_v58 = vadd.f32 %v655_v33, %v567_v50 }
 0x25e   :  { %v714_v13 = vmax.f32 %v656_v58, 0.0 }
 0x260   :  { %v581_v58 = vpop.f32.mrf.mxu1 }
 0x263   :  { %v657_v52 = vpop.f32.mrf.mxu2 }
 0x264   :  { %v658_v59 = vadd.f32 %v657_v52, %v569_v49  ;;  %v577_v49 = vadd.f32 %v2144_v0, %v576_v56  ;;  %v582_v56 = vadd.f32 %v2144_v0, %v581_v58 }
 0x266   :  { %v715_v18 = vmax.f32 %v658_v59, 0.0 }
 0x268   :  { %v739_v6 = vpack.c.bf16 %v715_v18, %v714_v13 }
 0x26a   :  { %855 = vmatmul.bf16.gmra.mxu3 %v739_v6 }
 0x26b   :  { %v660_v55 = vpop.f32.mrf.mxu2 }
 0x26c   :  { %v661_v37 = vadd.f32 %v660_v55, %v572_v36 }
 0x26e   :  { %v716_v38 = vmax.f32 %v661_v37, 0.0 }
 0x273   :  { %v662_v41 = vpop.f32.mrf.mxu2 }
 0x274   :  { %v663_v42 = vadd.f32 %v662_v41, %v574_v22  ;;  %v583_v22 = vpop.f32.mrf.mxu1 }
 0x276   :  { %v717_v28 = vmax.f32 %v663_v42, 0.0  ;;  %v584_v42 = vadd.f32 %v2144_v0, %v583_v22 }
 0x278   :  { %v740_v60 = vpack.c.bf16 %v717_v28, %v716_v38 }
 0x27a   :  { %860 = vmatmul.bf16.gmra.mxu3 %v740_v60 }
 0x27b   :  { %v665_v33 = vpop.f32.mrf.mxu2 }
 0x27c   :  { %v666_v52 = vadd.f32 %v665_v33, %v577_v49  ;;  %v586_v60 = vpop.f32.mrf.mxu1 }
 0x27d   :  { %v2228_v50 = vpop.f32.mrf.mxu3 }
 0x27e   :  { %v718_v18 = vmax.f32 %v666_v52, 0.0  ;;  %v724_v52 = vmax.f32 %v2172_v54, 0.0 }
 0x283   :  { %v667_v15 = vpop.f32.mrf.mxu2 }
 0x284   :  { %v668_v59 = vadd.f32 %v667_v15, %v579_v4  ;;  %v588_v58 = vpop.f32.mrf.mxu1 }
 0x285   :  { %v2232_v13 = vpop.f32.mrf.mxu3 }
 0x286   :  { %v719_v6 = vmax.f32 %v668_v59, 0.0 }
 0x288   :  { %v741_v36 = vpack.c.bf16 %v719_v6, %v718_v18  ;;  %v587_v6 = vadd.f32 %v2144_v0, %v586_v60 }
 0x28a   :  { %865 = vmatmul.bf16.gmra.mxu3 %v741_v36  ;;  %v589_v36 = vadd.f32 %v2144_v0, %v588_v58 }
 0x28b   :  { %v670_v37 = vpop.f32.mrf.mxu2 }
 0x28c   :  { %v671_v38 = vadd.f32 %v670_v37, %v582_v56 }
 0x28d   :  { %v2236_v41 = vpop.f32.mrf.mxu3 }
 0x28e   :  { %v720_v49 = vmax.f32 %v671_v38, 0.0 }
 0x293   :  { %v672_v28 = vpop.f32.mrf.mxu2 }
 0x294   :  { %v673_v43 = vadd.f32 %v672_v28, %v584_v42 }
 0x295   :  { %v2240_v33 = vpop.f32.mrf.mxu3 }
 0x296   :  { %v721_v4 = vmax.f32 %v673_v43, 0.0 }
 0x298   :  { %v742_v15 = vpack.c.bf16 %v721_v4, %v720_v49  ;;  %v594_v49 = vadd.f32 %v2144_v0, %v2076_v26 }
 0x29a   :  { %870 = vmatmul.bf16.gmra.mxu3 %v742_v15  ;;  %v683_v4 = vadd.f32 %v2182_v16, %v594_v49 }
 0x29b   :  { %v675_v59 = vpop.f32.mrf.mxu2 }
 0x29c   :  { %v676_v22 = vadd.f32 %v675_v59, %v587_v6  ;;  %v725_v15 = vmax.f32 %v683_v4, 0.0  ;;  %v730_v4 = vmax.f32 %v2214_v21, 0.0  ;;  %v2511_v21 = vpack.c.bf16 %v2240_v33, %v2236_v41 }
 0x29d   :  { %v831_v18 = vpop.f32.mrf.mxu3 }
 0x29e   :  { %v722_v28 = vmax.f32 %v676_v22, 0.0  ;;  %v744_v59 = vpack.c.bf16 %v725_v15, %v724_v52 }
 0x2a3   :  { %v677_v37 = vpop.f32.mrf.mxu2 }
 0x2a4   :  { %v678_v56 = vadd.f32 %v677_v37, %v589_v36  ;;  %v599_v36 = vadd.f32 %v2144_v0, %v2110_v46  ;;  %v726_v37 = vmax.f32 %v2189_v51, 0.0 }
 0x2a5   :  { %v833_v42 = vpop.f32.mrf.mxu3 }
 0x2a6   :  { %v723_v55 = vmax.f32 %v678_v56, 0.0  ;;  %v903_v38 = vpack.c.bf16 %v833_v42, %v831_v18  ;;  %v604_v56 = vadd.f32 %v2144_v0, %v2135_v62  ;;  %v728_v42 = vmax.f32 %v2206_v5, 0.0 }
 0x2a8   :  { %v743_v43 = vpack.c.bf16 %v723_v55, %v722_v28  ;;  %v688_v55 = vadd.f32 %v2199_v7, %v599_v36  ;;  %v609_v7 = vadd.f32 %v2144_v0, %v2164_v23 }
 0x2aa   :  { %875 = vmatmul.bf16.gmra.mxu3 %v743_v43  ;;  %v727_v18 = vmax.f32 %v688_v55, 0.0  ;;  %v698_v51 = vadd.f32 %v2226_v32, %v609_v7 }
 0x2ac   :  { %v745_v26 = vpack.c.bf16 %v727_v18, %v726_v37  ;;  %v731_v43 = vmax.f32 %v698_v51, 0.0  ;;  %v2512_v18 = vpack.c.bf16 %v2232_v13, %v2228_v50 }
 0x2ad   :  { %v836_v40 = vpop.f32.mrf.mxu3 }
 0x2ae   :  { %v747_v15 = vpack.c.bf16 %v731_v43, %v730_v4 }
 0x2b5   :  { %v838_v60 = vpop.f32.mrf.mxu3 }
 0x2b6   :  { %v904_v58 = vpack.c.bf16 %v838_v60, %v836_v40  ;;  %v693_v40 = vadd.f32 %v2210_v29, %v604_v56 }
 0x2b8   :  { %v729_v54 = vmax.f32 %v693_v40, 0.0 }
 0x2ba   :  { %880 = vmatmul.bf16.gmra.mxu3 %v744_v59  ;;  %v746_v28 = vpack.c.bf16 %v729_v54, %v728_v42 }
 0x2bd   :  { %v841_v6 = vpop.f32.mrf.mxu3 }
 0x2c5   :  { %v843_v22 = vpop.f32.mrf.mxu3 }
 0x2c6   :  { %v905_v55 = vpack.c.bf16 %v843_v22, %v841_v6 }
 0x2ca   :  { %885 = vmatmul.bf16.gmra.mxu3 %v745_v26 }
 0x2cd   :  { %v846_v16 = vpop.f32.mrf.mxu3 }
 0x2d5   :  { %v848_v52 = vpop.f32.mrf.mxu3 }
 0x2d6   :  { %v906_v36 = vpack.c.bf16 %v848_v52, %v846_v16 }
 0x2da   :  { %890 = vmatmul.bf16.gmra.mxu3 %v746_v28 }
 0x2dd   :  { %v851_v46 = vpop.f32.mrf.mxu3 }
 0x2e5   :  { %v853_v49 = vpop.f32.mrf.mxu3 }
 0x2e6   :  { %v907_v59 = vpack.c.bf16 %v853_v49, %v851_v46  ;;  %v1695_v46 = vld [vmem:[%s2499_s6 + $0x18] sm:$0xff] }
 0x2ea   :  { %895 = vmatmul.bf16.gmra.mxu3 %v747_v15 }
 0x2ed   :  { %v856_v62 = vpop.f32.mrf.mxu3 }
 0x2f5   :  { %v858_v29 = vpop.f32.mrf.mxu3 }
 0x2f6   :  { %v908_v60 = vpack.c.bf16 %v858_v29, %v856_v62 }
 0x2f8   :  { %921 = vmatpush.bf16.msrb.mxu0 %v908_v60 }
 0x2fc   :  { %922 = vmatpush.bf16.msrb.mxu0 %v907_v59 }
 0x2fd   :  { %v861_v5 = vpop.f32.mrf.mxu3 }
 0x300   :  { %923 = vmatpush.bf16.msrb.mxu0 %v906_v36 }
 0x304   :  { %924 = vmatpush.bf16.msrb.mxu0 %v905_v55 }
 0x305   :  { %v863_v0 = vpop.f32.mrf.mxu3 }
 0x306   :  { %v909_v23 = vpack.c.bf16 %v863_v0, %v861_v5 }
 0x308   :  { %925 = vmatpush.bf16.msrb.mxu0 %v904_v58 }
 0x30c   :  { %926 = vmatpush.bf16.msrb.mxu0 %v903_v38 }
 0x30d   :  { %v866_v32 = vpop.f32.mrf.mxu3 }
 0x310   :  { %927 = vmatpush.bf16.msrb.mxu0 %v2511_v21 }
 0x314   :  { %928 = vmatpush.bf16.msrb.mxu0 %v2512_v18 }
 0x315   :  { %v868_v37 = vpop.f32.mrf.mxu3 }
 0x316   :  { %v910_v26 = vpack.c.bf16 %v868_v37, %v866_v32 }
 0x317   :  { %929 = vmatmul.bf16.vlgmr.msrb.gmra.mxu0 %v1873_v8 }
 0x31d   :  { %v871_v16 = vpop.f32.mrf.mxu3 }
 0x325   :  { %v873_v6 = vpop.f32.mrf.mxu3 }
 0x326   :  { %v911_v22 = vpack.c.bf16 %v873_v6, %v871_v16 }
 0x327   :  { %934 = vmatmul.bf16.gmra.mxu0 %v1885_v14  ;;  %v1699_v14 = vld [vmem:[%s2499_s6 + $0x38] sm:$0xff] }
 0x328   :  { %1215 = vmatpush.bf16.msrb.mxu2 %v1699_v14 }
 0x32d   :  { %v876_v58 = vpop.f32.mrf.mxu3 }
 0x335   :  { %v878_v38 = vpop.f32.mrf.mxu3 }
 0x336   :  { %v912_v56 = vpack.c.bf16 %v878_v38, %v876_v58 }
 0x337   :  { %939 = vmatmul.bf16.gmra.mxu0 %v1906_v25  ;;  %v1698_v25 = vld [vmem:[%s2499_s6 + $0x30] sm:$0xff] }
 0x338   :  { %1216 = vmatpush.bf16.msrb.mxu2 %v1698_v25  ;;  %v2513_v25 = vld [vmem:[#allocation2_spill] sm:$0xff] }
 0x33d   :  { %v881_v41 = vpop.f32.mrf.mxu3 }
 0x345   :  { %v883_v33 = vpop.f32.mrf.mxu3 }
 0x346   :  { %v913_v28 = vpack.c.bf16 %v883_v33, %v881_v41 }
 0x347   :  { %944 = vmatmul.bf16.gmra.mxu0 %v1934_v35 }
 0x34d   :  { %v886_v50 = vpop.f32.mrf.mxu3 }
 0x355   :  { %v888_v13 = vpop.f32.mrf.mxu3 }
 0x357   :  { %949 = vmatmul.bf16.gmra.mxu0 %v1961_v44  ;;  %v1697_v44 = vld [vmem:[%s2499_s6 + $0x28] sm:$0xff] }
 0x358   :  { %1217 = vmatpush.bf16.msrb.mxu2 %v1697_v44 }
 0x35d   :  { %v891_v40 = vpop.f32.mrf.mxu3 }
 0x365   :  { %v893_v8 = vpop.f32.mrf.mxu3 }
 0x366   :  { %v915_v35 = vpack.c.bf16 %v893_v8, %v891_v40 }
 0x367   :  { %954 = vmatmul.bf16.gmra.mxu0 %v1988_v53  ;;  %v914_v53 = vpack.c.bf16 %v888_v13, %v886_v50 }
 0x36d   :  { %v896_v54 = vpop.f32.mrf.mxu3 }
 0x375   :  { %v898_v52 = vpop.f32.mrf.mxu3 }
 0x376   :  { %v916_v42 = vpack.c.bf16 %v898_v52, %v896_v54 }
 0x377   :  { %959 = vmatmul.bf16.gmra.mxu0 %v2024_v2  ;;  %v1696_v2 = vld [vmem:[%s2499_s6 + $0x20] sm:$0xff] }
 0x378   :  { %1010 = vmatpush.bf16.msrb.mxu1 %v916_v42  ;;  %1218 = vmatpush.bf16.msrb.mxu2 %v1696_v2 }
 0x37c   :  { %1011 = vmatpush.bf16.msrb.mxu1 %v915_v35  ;;  %1219 = vmatpush.bf16.msrb.mxu2 %v1695_v46 }
 0x380   :  { %1012 = vmatpush.bf16.msrb.mxu1 %v914_v53 }
 0x384   :  { %1013 = vmatpush.bf16.msrb.mxu1 %v913_v28 }
 0x387   :  { %964 = vmatmul.bf16.gmra.mxu0 %v2045_v11 }
 0x388   :  { %1014 = vmatpush.bf16.msrb.mxu1 %v912_v56 }
 0x38c   :  { %1015 = vmatpush.bf16.msrb.mxu1 %v911_v22 }
 0x390   :  { %1016 = vmatpush.bf16.msrb.mxu1 %v910_v26 }
 0x394   :  { %1017 = vmatpush.bf16.msrb.mxu1 %v909_v23 }
 0x397   :  { %1018 = vmatmul.bf16.vlgmr.msrb.gmra.mxu1 %v1920_v31  ;;  %969 = vmatmul.bf16.gmra.mxu0 %v2074_v24  ;;  %v1694_v31 = vld [vmem:[%s2499_s6 + $0x10] sm:$0xff] }
 0x398   :  { %1220 = vmatpush.bf16.msrb.mxu2 %v1694_v31 }
 0x3a7   :  { %1023 = vmatmul.bf16.gmra.mxu1 %v1945_v39  ;;  %974 = vmatmul.bf16.gmra.mxu0 %v2108_v45  ;;  %v1693_v39 = vld [vmem:[%s2499_s6 + $0x8] sm:$0xff] }
 0x3a8   :  { %1221 = vmatpush.bf16.msrb.mxu2 %v1693_v39 }
 0x3b7   :  { %1028 = vmatmul.bf16.gmra.mxu1 %v1972_v48  ;;  %979 = vmatmul.bf16.gmra.mxu0 %v2133_v61  ;;  %v930_v48 = vpop.f32.mrf.mxu0 }
 0x3bf   :  { %v932_v11 = vpop.f32.mrf.mxu0 }
 0x3c7   :  { %1033 = vmatmul.bf16.gmra.mxu1 %v1999_v57  ;;  %984 = vmatmul.bf16.gmra.mxu0 %v2162_v20  ;;  %v1692_v57 = vld [vmem:[%s2499_s6] sm:$0xff]  ;;  %v935_v24 = vpop.f32.mrf.mxu0 }
 0x3c8   :  { %1222 = vmatpush.bf16.msrb.mxu2 %v1692_v57 }
 0x3d7   :  { %1038 = vmatmul.bf16.gmra.mxu1 %v2026_v3  ;;  %989 = vmatmul.bf16.gmra.mxu0 %v1858_v1  ;;  %v937_v3 = vpop.f32.mrf.mxu0  ;;  %v2318_v1 = vld [vmem:[%s2500_s5] ss:$0 sm:$0xff] }
 0x3d8   :  { %v936_v62 = vadd.f32 %v2318_v1, %v935_v24  ;;  %v938_v60 = vadd.f32 %v2318_v1, %v937_v3 }
 0x3df   :  { %v940_v45 = vpop.f32.mrf.mxu0 }
 0x3e7   :  { %1043 = vmatmul.bf16.gmra.mxu1 %v2047_v12  ;;  %994 = vmatmul.bf16.gmra.mxu0 %v1875_v9  ;;  %v942_v61 = vpop.f32.mrf.mxu0  ;;  %v933_v9 = vadd.f32 %v2318_v1, %v932_v11  ;;  %v2514_v11 = vld [vmem:[#allocation3_spill] sm:$0xff] }
 0x3ef   :  { %v945_v20 = vpop.f32.mrf.mxu0 }
 0x3f0   :  { %v946_v56 = vadd.f32 %v2318_v1, %v945_v20 }
 0x3f7   :  { %1048 = vmatmul.bf16.gmra.mxu1 %v2078_v27  ;;  %999 = vmatmul.bf16.gmra.mxu0 %v1893_v17  ;;  %v931_v27 = vadd.f32 %v2318_v1, %v930_v48  ;;  %v947_v17 = vpop.f32.mrf.mxu0 }
 0x3ff   :  { %v950_v29 = vpop.f32.mrf.mxu0 }
 0x400   :  { %v951_v42 = vadd.f32 %v2318_v1, %v950_v29 }
 0x407   :  { %1053 = vmatmul.bf16.gmra.mxu1 %v2112_v47  ;;  %1004 = vmatmul.bf16.gmra.mxu0 %v1918_v30  ;;  %v952_v23 = vpop.f32.mrf.mxu0  ;;  %v941_v30 = vadd.f32 %v2318_v1, %v940_v45 }
 0x408   :  { %v953_v44 = vadd.f32 %v2318_v1, %v952_v23 }
 0x40f   :  { %v955_v21 = vpop.f32.mrf.mxu0 }
 0x410   :  { %v956_v48 = vadd.f32 %v2318_v1, %v955_v21 }
 0x414   :  { %v1019_v12 = vpop.f32.mrf.mxu1 }
 0x415   :  { %v1020_v7 = vadd.f32 %v1019_v12, %v931_v27 }
 0x417   :  { %1058 = vmatmul.bf16.gmra.mxu1 %v2137_v63  ;;  %v1099_v43 = vmax.f32 %v1020_v7, 0.0  ;;  %v957_v58 = vpop.f32.mrf.mxu0 }
 0x418   :  { %v958_v3 = vadd.f32 %v2318_v1, %v957_v58 }
 0x41c   :  { %v1021_v51 = vpop.f32.mrf.mxu1 }
 0x41d   :  { %v1022_v47 = vadd.f32 %v1021_v51, %v933_v9 }
 0x41f   :  { %v1100_v49 = vmax.f32 %v1022_v47, 0.0  ;;  %v960_v41 = vpop.f32.mrf.mxu0  ;;  %v2515_v47 = vld [vmem:[#allocation4_spill] sm:$0xff] }
 0x420   :  { %v961_v51 = vadd.f32 %v2318_v1, %v960_v41 }
 0x421   :  { %v1131_v4 = vpack.c.bf16 %v1100_v49, %v1099_v43 }
 0x423   :  { %1223 = vmatmul.bf16.vlgmr.msrb.gmra.mxu2 %v1131_v4 }
 0x424   :  { %v1024_v15 = vpop.f32.mrf.mxu1 }
 0x425   :  { %v1025_v63 = vadd.f32 %v1024_v15, %v936_v62 }
 0x427   :  { %1063 = vmatmul.bf16.gmra.mxu1 %v2166_v34  ;;  %v1101_v36 = vmax.f32 %v1025_v63, 0.0  ;;  %v943_v34 = vadd.f32 %v2318_v1, %v942_v61  ;;  %v962_v52 = vpop.f32.mrf.mxu0 }
 0x428   :  { %v963_v49 = vadd.f32 %v2318_v1, %v962_v52 }
 0x42c   :  { %v1026_v59 = vpop.f32.mrf.mxu1 }
 0x42d   :  { %v1027_v5 = vadd.f32 %v1026_v59, %v938_v60 }
 0x42f   :  { %v1102_v55 = vmax.f32 %v1027_v5, 0.0  ;;  %v965_v28 = vpop.f32.mrf.mxu0 }
 0x430   :  { %v966_v5 = vadd.f32 %v2318_v1, %v965_v28 }
 0x431   :  { %v1132_v0 = vpack.c.bf16 %v1102_v55, %v1101_v36  ;;  %v2516_v36 = vld [vmem:[#allocation5_spill] sm:$0xff] }
 0x433   :  { %1228 = vmatmul.bf16.gmra.mxu2 %v1132_v0 }
 0x434   :  { %v1029_v32 = vpop.f32.mrf.mxu1 }
 0x435   :  { %v1030_v18 = vadd.f32 %v1029_v32, %v941_v30 }
 0x437   :  { %1068 = vmatmul.bf16.gmra.mxu1 %v2184_v19  ;;  %v1103_v16 = vmax.f32 %v1030_v18, 0.0  ;;  %v948_v19 = vadd.f32 %v2318_v1, %v947_v17  ;;  %v967_v57 = vpop.f32.mrf.mxu0 }
 0x438   :  { %v968_v0 = vadd.f32 %v2318_v1, %v967_v57 }
 0x43c   :  { %v1031_v37 = vpop.f32.mrf.mxu1 }
 0x43d   :  { %v1032_v26 = vadd.f32 %v1031_v37, %v943_v34 }
 0x43f   :  { %v1104_v6 = vmax.f32 %v1032_v26, 0.0  ;;  %v970_v7 = vpop.f32.mrf.mxu0 }
 0x440   :  { %v971_v26 = vadd.f32 %v2318_v1, %v970_v7 }
 0x441   :  { %v1133_v22 = vpack.c.bf16 %v1104_v6, %v1103_v16 }
 0x443   :  { %1233 = vmatmul.bf16.gmra.mxu2 %v1133_v22 }
 0x444   :  { %v1034_v38 = vpop.f32.mrf.mxu1 }
 0x445   :  { %v1035_v33 = vadd.f32 %v1034_v38, %v946_v56 }
 0x447   :  { %1073 = vmatmul.bf16.gmra.mxu1 %v2201_v10  ;;  %v1105_v40 = vmax.f32 %v1035_v33, 0.0  ;;  %v972_v17 = vpop.f32.mrf.mxu0 }
 0x448   :  { %v973_v22 = vadd.f32 %v2318_v1, %v972_v17 }
 0x44c   :  { %v1036_v50 = vpop.f32.mrf.mxu1 }
 0x44d   :  { %v1037_v13 = vadd.f32 %v1036_v50, %v948_v19  ;;  %v2350_v19 = vld [vmem:[%s2501_s7] ss:$0 sm:$0xff] }
 0x44f   :  { %v1106_v8 = vmax.f32 %v1037_v13, 0.0  ;;  %v975_v59 = vpop.f32.mrf.mxu0 }
 0x451   :  { %v1134_v54 = vpack.c.bf16 %v1106_v8, %v1105_v40  ;;  %v976_v8 = vadd.f32 %v2318_v1, %v975_v59 }
 0x453   :  { %1238 = vmatmul.bf16.gmra.mxu2 %v1134_v54 }
 0x454   :  { %v1039_v14 = vpop.f32.mrf.mxu1 }
 0x455   :  { %v1040_v35 = vadd.f32 %v1039_v14, %v951_v42 }
 0x457   :  { %1078 = vmatmul.bf16.gmra.mxu1 %v2513_v25  ;;  %v1107_v2 = vmax.f32 %v1040_v35, 0.0  ;;  %v977_v18 = vpop.f32.mrf.mxu0 }
 0x458   :  { %v978_v52 = vadd.f32 %v2318_v1, %v977_v18 }
 0x45c   :  { %v1041_v10 = vpop.f32.mrf.mxu1 }
 0x45d   :  { %v1042_v53 = vadd.f32 %v1041_v10, %v953_v44 }
 0x45f   :  { %v1108_v46 = vmax.f32 %v1042_v53, 0.0  ;;  %v980_v16 = vpop.f32.mrf.mxu0 }
 0x461   :  { %v1135_v31 = vpack.c.bf16 %v1108_v46, %v1107_v2 }
 0x463   :  { %1243 = vmatmul.bf16.gmra.mxu2 %v1135_v31 }
 0x464   :  { %v1044_v39 = vpop.f32.mrf.mxu1 }
 0x465   :  { %v1045_v24 = vadd.f32 %v1044_v39, %v956_v48  ;;  %v981_v39 = vadd.f32 %v2318_v1, %v980_v16 }
 0x467   :  { %1083 = vmatmul.bf16.gmra.mxu1 %v2514_v11  ;;  %v1109_v12 = vmax.f32 %v1045_v24, 0.0  ;;  %v982_v13 = vpop.f32.mrf.mxu0 }
 0x468   :  { %v983_v24 = vadd.f32 %v2318_v1, %v982_v13 }
 0x46c   :  { %v1046_v45 = vpop.f32.mrf.mxu1 }
 0x46d   :  { %v1047_v61 = vadd.f32 %v1046_v45, %v958_v3 }
 0x46f   :  { %v1110_v27 = vmax.f32 %v1047_v61, 0.0  ;;  %v985_v44 = vpop.f32.mrf.mxu0 }
 0x471   :  { %v1136_v20 = vpack.c.bf16 %v1110_v27, %v1109_v12 }
 0x473   :  { %1248 = vmatmul.bf16.gmra.mxu2 %v1136_v20 }
 0x474   :  { %v1049_v9 = vpop.f32.mrf.mxu1 }
 0x475   :  { %v1050_v43 = vadd.f32 %v1049_v9, %v961_v51 }
 0x477   :  { %1088 = vmatmul.bf16.gmra.mxu1 %v2515_v47  ;;  %v1111_v62 = vmax.f32 %v1050_v43, 0.0  ;;  %v987_v11 = vpop.f32.mrf.mxu0  ;;  %v986_v43 = vadd.f32 %v2318_v1, %v985_v44 }
 0x478   :  { %v988_v17 = vadd.f32 %v2318_v1, %v987_v11 }
 0x47c   :  { %v1051_v4 = vpop.f32.mrf.mxu1 }
 0x47d   :  { %v1052_v15 = vadd.f32 %v1051_v4, %v963_v49 }
 0x47f   :  { %v1112_v29 = vmax.f32 %v1052_v15, 0.0  ;;  %v990_v9 = vpop.f32.mrf.mxu0 }
 0x481   :  { %v1137_v63 = vpack.c.bf16 %v1112_v29, %v1111_v62 }
 0x483   :  { %1253 = vmatmul.bf16.gmra.mxu2 %v1137_v63 }
 0x484   :  { %v1054_v60 = vpop.f32.mrf.mxu1 }
 0x485   :  { %v1055_v55 = vadd.f32 %v1054_v60, %v966_v5 }
 0x487   :  { %1093 = vmatmul.bf16.gmra.mxu1 %v2516_v36  ;;  %v1113_v30 = vmax.f32 %v1055_v55, 0.0  ;;  %v992_v62 = vpop.f32.mrf.mxu0 }
 0x488   :  { %v993_v18 = vadd.f32 %v2318_v1, %v992_v62 }
 0x48c   :  { %v1056_v23 = vpop.f32.mrf.mxu1 }
 0x48d   :  { %v1057_v32 = vadd.f32 %v1056_v23, %v968_v0 }
 0x48f   :  { %v1114_v21 = vmax.f32 %v1057_v32, 0.0  ;;  %v995_v23 = vpop.f32.mrf.mxu0  ;;  %v991_v32 = vadd.f32 %v2318_v1, %v990_v9 }
 0x491   :  { %v1138_v34 = vpack.c.bf16 %v1114_v21, %v1113_v30 }
 0x493   :  { %1258 = vmatmul.bf16.gmra.mxu2 %v1138_v34 }
 0x494   :  { %v1059_v37 = vpop.f32.mrf.mxu1 }
 0x495   :  { %v1060_v6 = vadd.f32 %v1059_v37, %v971_v26 }
 0x497   :  { %v1115_v56 = vmax.f32 %v1060_v6, 0.0 }
 0x49c   :  { %v1061_v58 = vpop.f32.mrf.mxu1 }
 0x49d   :  { %v1062_v38 = vadd.f32 %v1061_v58, %v973_v22  ;;  %v997_v58 = vpop.f32.mrf.mxu0 }
 0x49f   :  { %v1116_v41 = vmax.f32 %v1062_v38, 0.0 }
 0x4a1   :  { %v1139_v33 = vpack.c.bf16 %v1116_v41, %v1115_v56 }
 0x4a3   :  { %1263 = vmatmul.bf16.gmra.mxu2 %v1139_v33  ;;  %v996_v33 = vadd.f32 %v2318_v1, %v995_v23 }
 0x4a4   :  { %v1064_v50 = vpop.f32.mrf.mxu1 }
 0x4a5   :  { %v1065_v14 = vadd.f32 %v1064_v50, %v976_v8  ;;  %v1000_v13 = vpop.f32.mrf.mxu0  ;;  %v998_v8 = vadd.f32 %v2318_v1, %v997_v58 }
 0x4a6   :  { %v1224_v40 = vpop.f32.mrf.mxu2 }
 0x4a7   :  { %v1225_v54 = vadd.f32 %v2350_v19, %v1224_v40  ;;  %v1117_v10 = vmax.f32 %v1065_v14, 0.0 }
 0x4a9   :  { %1304 = vst [vmem:[%s2502_s8] sm:$0xff] %v1225_v54 }
 0x4ac   :  { %v1066_v42 = vpop.f32.mrf.mxu1 }
 0x4ad   :  { %v1067_v25 = vadd.f32 %v1066_v42, %v978_v52 }
 0x4ae   :  { %v1226_v35 = vpop.f32.mrf.mxu2 }
 0x4af   :  { %v1118_v53 = vmax.f32 %v1067_v25, 0.0  ;;  %v1227_v28 = vadd.f32 %v2350_v19, %v1226_v35 }
 0x4b1   :  { %v1140_v2 = vpack.c.bf16 %v1118_v53, %v1117_v10  ;;  %1305 = vst [vmem:[%s2502_s8 + $0x8] sm:$0xff] %v1227_v28  ;;  %v1002_v53 = vpop.f32.mrf.mxu0 }
 0x4b3   :  { %1268 = vmatmul.bf16.gmra.mxu2 %v1140_v2  ;;  %v1001_v2 = vadd.f32 %v2318_v1, %v1000_v13 }
 0x4b4   :  { %v1069_v46 = vpop.f32.mrf.mxu1 }
 0x4b5   :  { %v1070_v57 = vadd.f32 %v1069_v46, %v981_v39  ;;  %v1003_v39 = vadd.f32 %v2318_v1, %v1002_v53 }
 0x4b6   :  { %v1229_v31 = vpop.f32.mrf.mxu2 }
 0x4b7   :  { %v1230_v48 = vadd.f32 %v2350_v19, %v1229_v31  ;;  %v1119_v12 = vmax.f32 %v1070_v57, 0.0 }
 0x4b9   :  { %1306 = vst [vmem:[%s2502_s8 + $0x10] sm:$0xff] %v1230_v48 }
 0x4bc   :  { %v1071_v3 = vpop.f32.mrf.mxu1 }
 0x4bd   :  { %v1072_v45 = vadd.f32 %v1071_v3, %v983_v24  ;;  %v1005_v24 = vpop.f32.mrf.mxu0 }
 0x4be   :  { %v1231_v61 = vpop.f32.mrf.mxu2 }
 0x4bf   :  { %v1120_v27 = vmax.f32 %v1072_v45, 0.0  ;;  %v1232_v20 = vadd.f32 %v2350_v19, %v1231_v61 }
 0x4c1   :  { %v1141_v7 = vpack.c.bf16 %v1120_v27, %v1119_v12  ;;  %1307 = vst [vmem:[%s2502_s8 + $0x18] sm:$0xff] %v1232_v20 }
 0x4c3   :  { %1273 = vmatmul.bf16.gmra.mxu2 %v1141_v7  ;;  %v1006_v7 = vadd.f32 %v2318_v1, %v1005_v24 }
 0x4c4   :  { %v1074_v51 = vpop.f32.mrf.mxu1 }
 0x4c5   :  { %v1075_v4 = vadd.f32 %v1074_v51, %v986_v43  ;;  %v1007_v51 = vpop.f32.mrf.mxu0 }
 0x4c6   :  { %v1234_v47 = vpop.f32.mrf.mxu2  ;;  %v1008_v43 = vadd.f32 %v2318_v1, %v1007_v51 }
 0x4c7   :  { %v1235_v49 = vadd.f32 %v2350_v19, %v1234_v47  ;;  %v1121_v60 = vmax.f32 %v1075_v4, 0.0 }
 0x4c9   :  { %1308 = vst [vmem:[%s2502_s8 + $0x20] sm:$0xff] %v1235_v49 }
 0x4cc   :  { %v1076_v15 = vpop.f32.mrf.mxu1 }
 0x4cd   :  { %v1077_v29 = vadd.f32 %v1076_v15, %v988_v17 }
 0x4ce   :  { %v1236_v63 = vpop.f32.mrf.mxu2 }
 0x4cf   :  { %v1122_v59 = vmax.f32 %v1077_v29, 0.0  ;;  %v1237_v5 = vadd.f32 %v2350_v19, %v1236_v63 }
 0x4d1   :  { %v1142_v36 = vpack.c.bf16 %v1122_v59, %v1121_v60  ;;  %1309 = vst [vmem:[%s2502_s8 + $0x28] sm:$0xff] %v1237_v5 }
 0x4d3   :  { %1278 = vmatmul.bf16.gmra.mxu2 %v1142_v36 }
 0x4d4   :  { %v1079_v55 = vpop.f32.mrf.mxu1 }
 0x4d5   :  { %v1080_v21 = vadd.f32 %v1079_v55, %v991_v32 }
 0x4d6   :  { %v1239_v0 = vpop.f32.mrf.mxu2 }
 0x4d7   :  { %v1240_v30 = vadd.f32 %v2350_v19, %v1239_v0  ;;  %v1123_v16 = vmax.f32 %v1080_v21, 0.0 }
 0x4d9   :  { %1310 = vst [vmem:[%s2502_s8 + $0x30] sm:$0xff] %v1240_v30 }
 0x4dc   :  { %v1081_v34 = vpop.f32.mrf.mxu1 }
 0x4dd   :  { %v1082_v37 = vadd.f32 %v1081_v34, %v993_v18 }
 0x4de   :  { %v1241_v26 = vpop.f32.mrf.mxu2 }
 0x4df   :  { %v1124_v6 = vmax.f32 %v1082_v37, 0.0  ;;  %v1242_v22 = vadd.f32 %v2350_v19, %v1241_v26 }
 0x4e1   :  { %v1143_v38 = vpack.c.bf16 %v1124_v6, %v1123_v16  ;;  %1311 = vst [vmem:[%s2502_s8 + $0x38] sm:$0xff] %v1242_v22 }
 0x4e3   :  { %1283 = vmatmul.bf16.gmra.mxu2 %v1143_v38 }
 0x4e4   :  { %v1084_v56 = vpop.f32.mrf.mxu1 }
 0x4e5   :  { %v1085_v40 = vadd.f32 %v1084_v56, %v996_v33 }
 0x4e6   :  { %v1244_v41 = vpop.f32.mrf.mxu2 }
 0x4e7   :  { %v1245_v50 = vadd.f32 %v2350_v19, %v1244_v41  ;;  %v1125_v42 = vmax.f32 %v1085_v40, 0.0 }
 0x4e9   :  { %1312 = vst [vmem:[%s2502_s8 + $0x40] sm:$0xff] %v1245_v50 }
 0x4ec   :  { %v1086_v54 = vpop.f32.mrf.mxu1 }
 0x4ed   :  { %v1087_v14 = vadd.f32 %v1086_v54, %v998_v8 }
 0x4ee   :  { %v1246_v52 = vpop.f32.mrf.mxu2 }
 0x4ef   :  { %v1126_v25 = vmax.f32 %v1087_v14, 0.0  ;;  %v1247_v35 = vadd.f32 %v2350_v19, %v1246_v52 }
 0x4f1   :  { %v1144_v44 = vpack.c.bf16 %v1126_v25, %v1125_v42  ;;  %1313 = vst [vmem:[%s2502_s8 + $0x48] sm:$0xff] %v1247_v35 }
 0x4f3   :  { %1288 = vmatmul.bf16.gmra.mxu2 %v1144_v44 }
 0x4f4   :  { %v1089_v10 = vpop.f32.mrf.mxu1 }
 0x4f5   :  { %v1090_v31 = vadd.f32 %v1089_v10, %v1001_v2 }
 0x4f6   :  { %v1249_v28 = vpop.f32.mrf.mxu2 }
 0x4f7   :  { %v1250_v46 = vadd.f32 %v2350_v19, %v1249_v28  ;;  %v1127_v3 = vmax.f32 %v1090_v31, 0.0 }
 0x4f9   :  { %1314 = vst [vmem:[%s2502_s8 + $0x50] sm:$0xff] %v1250_v46 }
 0x4fc   :  { %v1091_v48 = vpop.f32.mrf.mxu1 }
 0x4fd   :  { %v1092_v11 = vadd.f32 %v1091_v48, %v1003_v39 }
 0x4fe   :  { %v1251_v57 = vpop.f32.mrf.mxu2 }
 0x4ff   :  { %v1128_v45 = vmax.f32 %v1092_v11, 0.0  ;;  %v1252_v61 = vadd.f32 %v2350_v19, %v1251_v57 }
 0x501   :  { %v1145_v12 = vpack.c.bf16 %v1128_v45, %v1127_v3  ;;  %1315 = vst [vmem:[%s2502_s8 + $0x58] sm:$0xff] %v1252_v61 }
 0x503   :  { %1293 = vmatmul.bf16.gmra.mxu2 %v1145_v12 }
 0x504   :  { %v1094_v27 = vpop.f32.mrf.mxu1 }
 0x505   :  { %v1095_v47 = vadd.f32 %v1094_v27, %v1006_v7 }
 0x506   :  { %v1254_v20 = vpop.f32.mrf.mxu2 }
 0x507   :  { %v1255_v9 = vadd.f32 %v2350_v19, %v1254_v20  ;;  %v1129_v15 = vmax.f32 %v1095_v47, 0.0 }
 0x509   :  { %1316 = vst [vmem:[%s2502_s8 + $0x60] sm:$0xff] %v1255_v9 }
 0x50c   :  { %v1096_v49 = vpop.f32.mrf.mxu1 }
 0x50d   :  { %v1097_v4 = vadd.f32 %v1096_v49, %v1008_v43 }
 0x50e   :  { %v1256_v17 = vpop.f32.mrf.mxu2 }
 0x50f   :  { %v1130_v62 = vmax.f32 %v1097_v4, 0.0  ;;  %v1257_v29 = vadd.f32 %v2350_v19, %v1256_v17 }
 0x511   :  { %v1146_v63 = vpack.c.bf16 %v1130_v62, %v1129_v15  ;;  %1317 = vst [vmem:[%s2502_s8 + $0x68] sm:$0xff] %v1257_v29 }
 0x513   :  { %1298 = vmatmul.bf16.gmra.mxu2 %v1146_v63 }
 0x516   :  { %v1259_v60 = vpop.f32.mrf.mxu2 }
 0x517   :  { %v1260_v59 = vadd.f32 %v2350_v19, %v1259_v60 }
 0x519   :  { %1318 = vst [vmem:[%s2502_s8 + $0x70] sm:$0xff] %v1260_v59 }
 0x51e   :  { %v1261_v1 = vpop.f32.mrf.mxu2 }
 0x51f   :  { %v1262_v5 = vadd.f32 %v2350_v19, %v1261_v1 }
 0x521   :  { %1319 = vst [vmem:[%s2502_s8 + $0x78] sm:$0xff] %v1262_v5 }
 0x526   :  { %v1264_v36 = vpop.f32.mrf.mxu2 }
 0x527   :  { %v1265_v55 = vadd.f32 %v2350_v19, %v1264_v36 }
 0x529   :  { %1320 = vst [vmem:[%s2502_s8 + $0x80] sm:$0xff] %v1265_v55 }
 0x52e   :  { %v1266_v0 = vpop.f32.mrf.mxu2 }
 0x52f   :  { %v1267_v23 = vadd.f32 %v2350_v19, %v1266_v0 }
 0x531   :  { %1321 = vst [vmem:[%s2502_s8 + $0x88] sm:$0xff] %v1267_v23 }
 0x536   :  { %v1269_v32 = vpop.f32.mrf.mxu2 }
 0x537   :  { %v1270_v30 = vadd.f32 %v2350_v19, %v1269_v32 }
 0x539   :  { %1322 = vst [vmem:[%s2502_s8 + $0x90] sm:$0xff] %v1270_v30 }
 0x53e   :  { %v1271_v21 = vpop.f32.mrf.mxu2 }
 0x53f   :  { %v1272_v18 = vadd.f32 %v2350_v19, %v1271_v21 }
 0x541   :  { %1323 = vst [vmem:[%s2502_s8 + $0x98] sm:$0xff] %v1272_v18 }
 0x546   :  { %v1274_v34 = vpop.f32.mrf.mxu2 }
 0x547   :  { %v1275_v37 = vadd.f32 %v2350_v19, %v1274_v34 }
 0x549   :  { %1324 = vst [vmem:[%s2502_s8 + $0xa0] sm:$0xff] %v1275_v37 }
 0x54e   :  { %v1276_v26 = vpop.f32.mrf.mxu2 }
 0x54f   :  { %v1277_v16 = vadd.f32 %v2350_v19, %v1276_v26 }
 0x551   :  { %1325 = vst [vmem:[%s2502_s8 + $0xa8] sm:$0xff] %v1277_v16 }
 0x556   :  { %v1279_v6 = vpop.f32.mrf.mxu2 }
 0x557   :  { %v1280_v22 = vadd.f32 %v2350_v19, %v1279_v6 }
 0x559   :  { %1326 = vst [vmem:[%s2502_s8 + $0xb0] sm:$0xff] %v1280_v22 }
 0x55e   :  { %v1281_v58 = vpop.f32.mrf.mxu2 }
 0x55f   :  { %v1282_v38 = vadd.f32 %v2350_v19, %v1281_v58 }
 0x561   :  { %1327 = vst [vmem:[%s2502_s8 + $0xb8] sm:$0xff] %v1282_v38 }
 0x566   :  { %v1284_v56 = vpop.f32.mrf.mxu2 }
 0x567   :  { %v1285_v41 = vadd.f32 %v2350_v19, %v1284_v56 }
 0x569   :  { %1328 = vst [vmem:[%s2502_s8 + $0xc0] sm:$0xff] %v1285_v41 }
 0x56e   :  { %v1286_v33 = vpop.f32.mrf.mxu2 }
 0x56f   :  { %v1287_v50 = vadd.f32 %v2350_v19, %v1286_v33 }
 0x571   :  { %1329 = vst [vmem:[%s2502_s8 + $0xc8] sm:$0xff] %v1287_v50 }
 0x576   :  { %v1289_v13 = vpop.f32.mrf.mxu2 }
 0x577   :  { %v1290_v40 = vadd.f32 %v2350_v19, %v1289_v13 }
 0x579   :  { %1330 = vst [vmem:[%s2502_s8 + $0xd0] sm:$0xff] %v1290_v40 }
 0x57e   :  { %v1291_v8 = vpop.f32.mrf.mxu2 }
 0x57f   :  { %v1292_v54 = vadd.f32 %v2350_v19, %v1291_v8 }
 0x581   :  { %1331 = vst [vmem:[%s2502_s8 + $0xd8] sm:$0xff] %v1292_v54 }
 0x586   :  { %v1294_v14 = vpop.f32.mrf.mxu2 }
 0x587   :  { %v1295_v52 = vadd.f32 %v2350_v19, %v1294_v14 }
 0x589   :  { %1332 = vst [vmem:[%s2502_s8 + $0xe0] sm:$0xff] %v1295_v52 }
 0x58e   :  { %v1296_v42 = vpop.f32.mrf.mxu2 }
 0x58f   :  { %v1297_v25 = vadd.f32 %v2350_v19, %v1296_v42 }
 0x591   :  { %1333 = vst [vmem:[%s2502_s8 + $0xe8] sm:$0xff] %v1297_v25 }
 0x596   :  { %v1299_v35 = vpop.f32.mrf.mxu2 }
 0x597   :  { %v1300_v44 = vadd.f32 %v2350_v19, %v1299_v35 }
 0x599   :  { %1334 = vst [vmem:[%s2502_s8 + $0xf0] sm:$0xff] %v1300_v44 }
 0x59e   :  { %v1301_v10 = vpop.f32.mrf.mxu2 }
 0x59f   :  { %v1302_v53 = vadd.f32 %v2350_v19, %v1301_v10 }
 0x5a1   :  { %1335 = vst [vmem:[%s2502_s8 + $0xf8] sm:$0xff] %v1302_v53 }

</bundles_post_ra>
